<compile_context>
chip_gen: v7x
topology: tpu7x:2x2x1
jax: 0.10.0
libtpu: 0.0.40
codegen_flags: <defaults>
</compile_context>

<pallas_src>
import numpy as np

import jax
import jax.numpy as jnp
from jax.experimental import pallas as pl
from jax.experimental.pallas import tpu as pltpu


def _round_up(a, b):
    return (a + b - 1) // b * b


def _reference_embed(x, freq_bands, include_input=True, periodic_fns=(jnp.sin, jnp.cos)):
    parts = [x] if include_input else []
    for f in np.asarray(freq_bands, dtype=np.float32):
        for fn in periodic_fns:
            parts.append(fn(x * jnp.float32(f)))
    return jnp.concatenate(parts, axis=1)


def make_embedder(input_dims=3,
                  include_input=True,
                  max_freq_log2=9,
                  num_freqs=10,
                  log_sampling=True,
                  periodic_fns=(jnp.sin, jnp.cos),
                  tile_n=2048):
    """Builds a Pallas-backed embed(x) mirroring the PyTorch Embedder forward."""
    assert num_freqs >= 1, "num_freqs must be >= 1"
    D = int(input_dims)
    F = int(num_freqs)
    P = len(periodic_fns)

    if log_sampling:
        freq_bands = 2.0 ** np.linspace(0.0, float(max_freq_log2), F)
    else:
        freq_bands = np.linspace(2.0 ** 0.0, 2.0 ** float(max_freq_log2), F)
    freq_bands = freq_bands.astype(np.float32)

    out_dim = (D if include_input else 0) + D * P * F

    # Per-row frequency multipliers for the (F*D, tile) lane-dense argument slab:
    # row r scales input-dim (r % D) by freq_bands[r // D].
    freq_col = jnp.asarray(np.repeat(freq_bands, D).reshape(F * D, 1))

    def _embed_rows(f_col, x):
        """x: (D, tile) f32 (points on lanes) -> (out_dim, tile) in torch row order."""
        xb = x if F == 1 else jnp.concatenate([x] * F, axis=0)   # (F*D, tile), sublane rep
        arg = xb * f_col                                         # (F*D,1) lane-broadcast
        vals = [fn(arg) for fn in periodic_fns]                  # one EUP pass per fn
        parts = [x] if include_input else []
        for k in range(F):
            for v in vals:
                parts.append(v[k * D:(k + 1) * D, :])
        return parts[0] if len(parts) == 1 else jnp.concatenate(parts, axis=0)

    # ---- primary kernel: lane-dense math + in-kernel transpose, direct (N, out_dim) store
    def direct_kernel(f_ref, xt_ref, o_ref):
        x = xt_ref[...].astype(jnp.float32)            # (D, tile)
        slab = _embed_rows(f_ref[...], x)              # (out_dim, tile)
        pad = (-out_dim) % 8                           # 8-align sublanes for the transpose
        if pad:
            slab = jnp.concatenate(
                [slab, jnp.zeros((pad, slab.shape[1]), slab.dtype)], axis=0)
        t = jnp.transpose(slab)                        # (tile, out_dim_padded) on the XLU
        o_ref[...] = t[:, :out_dim].astype(o_ref.dtype)

    # ---- fallback kernel: lane-dense (out_dim, N) output; wrapper transposes back
    def lanedense_kernel(f_ref, xt_ref, o_ref):
        x = xt_ref[...].astype(jnp.float32)
        o_ref[...] = _embed_rows(f_ref[...], x).astype(o_ref.dtype)

    def _pick_tile(n):
        # Big tiles amortize the ~0.35us/step pipeline overhead, but keep >= ~8
        # grid steps so megacore/parallel sharding still has work to split.
        return max(128, min(int(tile_n), _round_up(pl.cdiv(n, 8), 128)))

    def _cost(n):
        return pl.CostEstimate(flops=2 * n * F * D,
                               transcendentals=P * n * F * D,
                               bytes_accessed=4 * n * (D + out_dim))

    def _prep(x):
        n, d = x.shape
        assert d == D, f"expected last dim {D}, got {d}"
        tile = _pick_tile(n)
        n_pad = _round_up(n, tile)
        xt = jnp.transpose(x)                          # (D, n): points on the lane axis
        if n_pad != n:
            xt = jnp.pad(xt, ((0, 0), (0, n_pad - n)))
        return xt, n, n_pad, tile

    def _embed_direct(x):
        xt, n, n_pad, tile = _prep(x)
        return pl.pallas_call(
            direct_kernel,
            out_shape=jax.ShapeDtypeStruct((n, out_dim), x.dtype),
            grid_spec=pltpu.PrefetchScalarGridSpec(
                num_scalar_prefetch=0,
                grid=(n_pad // tile,),
                in_specs=[
                    pl.BlockSpec((F * D, 1), lambda i: (0, 0)),   # freq column
                    pl.BlockSpec((D, tile), lambda i: (0, i)),    # x^T tile
                ],
                out_specs=pl.BlockSpec((tile, out_dim), lambda i: (i, 0)),
            ),
            compiler_params=pltpu.CompilerParams(
                dimension_semantics=("parallel",)),
            cost_estimate=_cost(n),
        )(freq_col, xt)

    def _embed_lanedense(x):
        xt, n, n_pad, tile = _prep(x)
        out_t = pl.pallas_call(
            lanedense_kernel,
            out_shape=jax.ShapeDtypeStruct((out_dim, n_pad), x.dtype),
            grid_spec=pltpu.PrefetchScalarGridSpec(
                num_scalar_prefetch=0,
                grid=(n_pad // tile,),
                in_specs=[
                    pl.BlockSpec((F * D, 1), lambda i: (0, 0)),
                    pl.BlockSpec((D, tile), lambda i: (0, i)),
                ],
                out_specs=pl.BlockSpec((out_dim, tile), lambda i: (0, i)),
            ),
            compiler_params=pltpu.CompilerParams(
                dimension_semantics=("parallel",)),
            cost_estimate=_cost(n),
        )(freq_col, xt)
        return jnp.transpose(out_t[:, :n])             # (N, out_dim)

    def _direct_path_ok():
        # One-time probe: compile + numerically validate the direct kernel
        # (in-kernel transpose + ragged last output block). Fall back if rejected.
        try:
            n_probe = 300   # deliberately NOT a multiple of 128
            xp = jax.random.normal(jax.random.PRNGKey(123), (n_probe, D), jnp.float32)
            got = jax.block_until_ready(jax.jit(_embed_direct)(xp))
            ref = _reference_embed(xp, freq_bands, include_input, periodic_fns)
            np.testing.assert_allclose(np.asarray(got), np.asarray(ref),
                                       rtol=1e-5, atol=2e-5)
            return True
        except Exception:
            return False

    embed = jax.jit(_embed_direct if _direct_path_ok() else _embed_lanedense)
    return embed, out_dim, freq_bands


if __name__ == "__main__":
    # Standard NeRF config: 3-D coords, 10 freqs, include_input -> out_dim = 63.
    INPUT_DIMS = 3
    NUM_FREQS = 10
    MAX_FREQ_LOG2 = 9

    embed, out_dim, freq_bands = make_embedder(
        input_dims=INPUT_DIMS,
        include_input=True,
        max_freq_log2=MAX_FREQ_LOG2,
        num_freqs=NUM_FREQS,
        log_sampling=True,
        tile_n=2048,
    )

    key = jax.random.PRNGKey(0)
    N = 1000  # deliberately NOT a multiple of 128: exercises padding / ragged edge
    x = jax.random.normal(key, (N, INPUT_DIMS), dtype=jnp.float32)

    out = jax.block_until_ready(embed(x))

    ref = _reference_embed(x, freq_bands, include_input=True)
    assert out.shape == (N, out_dim), (out.shape, out_dim)
    np.testing.assert_allclose(np.asarray(out), np.asarray(ref),
                               rtol=1e-5, atol=2e-5)

    print("KERNEL_OK")
</pallas_src>

<mosaic_0001>
module attributes {stable_mosaic.version = 11 : i64} {
  func.func @direct_kernel(%arg0: i32, %arg1: memref<30x1xf32, #tpu.memory_space<vmem>>, %arg2: memref<3x128xf32, #tpu.memory_space<vmem>>, %arg3: memref<128x63xf32, #tpu.memory_space<vmem>>) attributes {dimension_semantics = [#tpu.dimension_semantics<parallel>], iteration_bounds = array<i64: 3>, scalar_prefetch = 0 : i64, scratch_operands = 0 : i64, tpu.core_type = #tpu.core_type<tc>, window_params = [{pipeline_mode = #tpu.pipeline_mode<synchronous>, transform_indices = @transform_0, window_bounds = array<i64: 30, 1>}, {transform_indices = @transform_1, window_bounds = array<i64: 3, 128>}, {transform_indices = @transform_2, window_bounds = array<i64: 128, 63>}]} {
    %c0 = arith.constant 0 : index
    %c0_0 = arith.constant 0 : index
    %0 = vector.load %arg2[%c0, %c0_0] : memref<3x128xf32, #tpu.memory_space<vmem>>, vector<3x128xf32>
    %c0_1 = arith.constant 0 : index
    %c0_2 = arith.constant 0 : index
    %1 = vector.load %arg1[%c0_1, %c0_2] : memref<30x1xf32, #tpu.memory_space<vmem>>, vector<30x1xf32>
    %2 = tpu.concatenate %0, %0, %0, %0, %0, %0, %0, %0, %0, %0 in 0 : vector<3x128xf32>, vector<3x128xf32>, vector<3x128xf32>, vector<3x128xf32>, vector<3x128xf32>, vector<3x128xf32>, vector<3x128xf32>, vector<3x128xf32>, vector<3x128xf32>, vector<3x128xf32> -> vector<30x128xf32>
    %3 = vector.broadcast %1 : vector<30x1xf32> to vector<30x128xf32>
    %4 = arith.mulf %2, %3 : vector<30x128xf32>
    %5 = math.sin %4 : vector<30x128xf32>
    %6 = math.cos %4 : vector<30x128xf32>
    %7 = vector.extract_strided_slice %5 {offsets = [0, 0], sizes = [3, 128], strides = [1, 1]} : vector<30x128xf32> to vector<3x128xf32>
    %8 = vector.extract_strided_slice %6 {offsets = [0, 0], sizes = [3, 128], strides = [1, 1]} : vector<30x128xf32> to vector<3x128xf32>
    %9 = vector.extract_strided_slice %5 {offsets = [3, 0], sizes = [3, 128], strides = [1, 1]} : vector<30x128xf32> to vector<3x128xf32>
    %10 = vector.extract_strided_slice %6 {offsets = [3, 0], sizes = [3, 128], strides = [1, 1]} : vector<30x128xf32> to vector<3x128xf32>
    %11 = vector.extract_strided_slice %5 {offsets = [6, 0], sizes = [3, 128], strides = [1, 1]} : vector<30x128xf32> to vector<3x128xf32>
    %12 = vector.extract_strided_slice %6 {offsets = [6, 0], sizes = [3, 128], strides = [1, 1]} : vector<30x128xf32> to vector<3x128xf32>
    %13 = vector.extract_strided_slice %5 {offsets = [9, 0], sizes = [3, 128], strides = [1, 1]} : vector<30x128xf32> to vector<3x128xf32>
    %14 = vector.extract_strided_slice %6 {offsets = [9, 0], sizes = [3, 128], strides = [1, 1]} : vector<30x128xf32> to vector<3x128xf32>
    %15 = vector.extract_strided_slice %5 {offsets = [12, 0], sizes = [3, 128], strides = [1, 1]} : vector<30x128xf32> to vector<3x128xf32>
    %16 = vector.extract_strided_slice %6 {offsets = [12, 0], sizes = [3, 128], strides = [1, 1]} : vector<30x128xf32> to vector<3x128xf32>
    %17 = vector.extract_strided_slice %5 {offsets = [15, 0], sizes = [3, 128], strides = [1, 1]} : vector<30x128xf32> to vector<3x128xf32>
    %18 = vector.extract_strided_slice %6 {offsets = [15, 0], sizes = [3, 128], strides = [1, 1]} : vector<30x128xf32> to vector<3x128xf32>
    %19 = vector.extract_strided_slice %5 {offsets = [18, 0], sizes = [3, 128], strides = [1, 1]} : vector<30x128xf32> to vector<3x128xf32>
    %20 = vector.extract_strided_slice %6 {offsets = [18, 0], sizes = [3, 128], strides = [1, 1]} : vector<30x128xf32> to vector<3x128xf32>
    %21 = vector.extract_strided_slice %5 {offsets = [21, 0], sizes = [3, 128], strides = [1, 1]} : vector<30x128xf32> to vector<3x128xf32>
    %22 = vector.extract_strided_slice %6 {offsets = [21, 0], sizes = [3, 128], strides = [1, 1]} : vector<30x128xf32> to vector<3x128xf32>
    %23 = vector.extract_strided_slice %5 {offsets = [24, 0], sizes = [3, 128], strides = [1, 1]} : vector<30x128xf32> to vector<3x128xf32>
    %24 = vector.extract_strided_slice %6 {offsets = [24, 0], sizes = [3, 128], strides = [1, 1]} : vector<30x128xf32> to vector<3x128xf32>
    %25 = vector.extract_strided_slice %5 {offsets = [27, 0], sizes = [3, 128], strides = [1, 1]} : vector<30x128xf32> to vector<3x128xf32>
    %26 = vector.extract_strided_slice %6 {offsets = [27, 0], sizes = [3, 128], strides = [1, 1]} : vector<30x128xf32> to vector<3x128xf32>
    %27 = tpu.concatenate %0, %7, %8, %9, %10, %11, %12, %13, %14, %15, %16, %17, %18, %19, %20, %21 in 0 : vector<3x128xf32>, vector<3x128xf32>, vector<3x128xf32>, vector<3x128xf32>, vector<3x128xf32>, vector<3x128xf32>, vector<3x128xf32>, vector<3x128xf32>, vector<3x128xf32>, vector<3x128xf32>, vector<3x128xf32>, vector<3x128xf32>, vector<3x128xf32>, vector<3x128xf32>, vector<3x128xf32>, vector<3x128xf32> -> vector<48x128xf32>
    %28 = tpu.concatenate %22, %23, %24, %25, %26 in 0 : vector<3x128xf32>, vector<3x128xf32>, vector<3x128xf32>, vector<3x128xf32>, vector<3x128xf32> -> vector<15x128xf32>
    %29 = tpu.concatenate %27, %28 in 0 : vector<48x128xf32>, vector<15x128xf32> -> vector<63x128xf32>
    %cst = arith.constant 0.000000e+00 : f32
    %30 = vector.broadcast %cst : f32 to vector<1x128xf32>
    %31 = tpu.concatenate %29, %30 in 0 : vector<63x128xf32>, vector<1x128xf32> -> vector<64x128xf32>
    %32 = tpu.transpose %31, [1, 0] : vector<64x128xf32> -> vector<128x64xf32>
    %33 = vector.extract_strided_slice %32 {offsets = [0, 0], sizes = [128, 63], strides = [1, 1]} : vector<128x64xf32> to vector<128x63xf32>
    %c0_3 = arith.constant 0 : index
    %c0_4 = arith.constant 0 : index
    %34 = vector.load %arg3[%c0_3, %c0_4] : memref<128x63xf32, #tpu.memory_space<vmem>>, vector<128x63xf32>
    tpu.vector_store %arg3[%c0_3, %c0_4], %33 {strides = array<i32>} : memref<128x63xf32, #tpu.memory_space<vmem>>, vector<128x63xf32>,
    return
  }
  func.func @transform_0(%arg0: i32) -> (i32, i32) {
    %c0_i32 = arith.constant 0 : i32
    %c0_i32_0 = arith.constant 0 : i32
    %c0_i32_1 = arith.constant 0 : i32
    return %c0_i32, %c0_i32_0 : i32, i32
  }
  func.func @transform_1(%arg0: i32) -> (i32, i32) {
    %c0_i32 = arith.constant 0 : i32
    %c0_i32_0 = arith.constant 0 : i32
    return %c0_i32, %arg0 : i32, i32
  }
  func.func @transform_2(%arg0: i32) -> (i32, i32) {
    %c0_i32 = arith.constant 0 : i32
    %c0_i32_0 = arith.constant 0 : i32
    return %arg0, %c0_i32 : i32, i32
  }
}

module attributes {stable_mosaic.version = 11 : i64} {
  func.func @lanedense_kernel(%arg0: i32, %arg1: memref<30x1xf32, #tpu.memory_space<vmem>>, %arg2: memref<3x128xf32, #tpu.memory_space<vmem>>, %arg3: memref<63x128xf32, #tpu.memory_space<vmem>>) attributes {dimension_semantics = [#tpu.dimension_semantics<parallel>], iteration_bounds = array<i64: 8>, scalar_prefetch = 0 : i64, scratch_operands = 0 : i64, tpu.core_type = #tpu.core_type<tc>, window_params = [{pipeline_mode = #tpu.pipeline_mode<synchronous>, transform_indices = @transform_0, window_bounds = array<i64: 30, 1>}, {transform_indices = @transform_1, window_bounds = array<i64: 3, 128>}, {transform_indices = @transform_2, window_bounds = array<i64: 63, 128>}]} {
    %c0 = arith.constant 0 : index
    %c0_0 = arith.constant 0 : index
    %0 = vector.load %arg2[%c0, %c0_0] : memref<3x128xf32, #tpu.memory_space<vmem>>, vector<3x128xf32>
    %c0_1 = arith.constant 0 : index
    %c0_2 = arith.constant 0 : index
    %1 = vector.load %arg1[%c0_1, %c0_2] : memref<30x1xf32, #tpu.memory_space<vmem>>, vector<30x1xf32>
    %2 = tpu.concatenate %0, %0, %0, %0, %0, %0, %0, %0, %0, %0 in 0 : vector<3x128xf32>, vector<3x128xf32>, vector<3x128xf32>, vector<3x128xf32>, vector<3x128xf32>, vector<3x128xf32>, vector<3x128xf32>, vector<3x128xf32>, vector<3x128xf32>, vector<3x128xf32> -> vector<30x128xf32>
    %3 = vector.broadcast %1 : vector<30x1xf32> to vector<30x128xf32>
    %4 = arith.mulf %2, %3 : vector<30x128xf32>
    %5 = math.sin %4 : vector<30x128xf32>
    %6 = math.cos %4 : vector<30x128xf32>
    %7 = vector.extract_strided_slice %5 {offsets = [0, 0], sizes = [3, 128], strides = [1, 1]} : vector<30x128xf32> to vector<3x128xf32>
    %8 = vector.extract_strided_slice %6 {offsets = [0, 0], sizes = [3, 128], strides = [1, 1]} : vector<30x128xf32> to vector<3x128xf32>
    %9 = vector.extract_strided_slice %5 {offsets = [3, 0], sizes = [3, 128], strides = [1, 1]} : vector<30x128xf32> to vector<3x128xf32>
    %10 = vector.extract_strided_slice %6 {offsets = [3, 0], sizes = [3, 128], strides = [1, 1]} : vector<30x128xf32> to vector<3x128xf32>
    %11 = vector.extract_strided_slice %5 {offsets = [6, 0], sizes = [3, 128], strides = [1, 1]} : vector<30x128xf32> to vector<3x128xf32>
    %12 = vector.extract_strided_slice %6 {offsets = [6, 0], sizes = [3, 128], strides = [1, 1]} : vector<30x128xf32> to vector<3x128xf32>
    %13 = vector.extract_strided_slice %5 {offsets = [9, 0], sizes = [3, 128], strides = [1, 1]} : vector<30x128xf32> to vector<3x128xf32>
    %14 = vector.extract_strided_slice %6 {offsets = [9, 0], sizes = [3, 128], strides = [1, 1]} : vector<30x128xf32> to vector<3x128xf32>
    %15 = vector.extract_strided_slice %5 {offsets = [12, 0], sizes = [3, 128], strides = [1, 1]} : vector<30x128xf32> to vector<3x128xf32>
    %16 = vector.extract_strided_slice %6 {offsets = [12, 0], sizes = [3, 128], strides = [1, 1]} : vector<30x128xf32> to vector<3x128xf32>
    %17 = vector.extract_strided_slice %5 {offsets = [15, 0], sizes = [3, 128], strides = [1, 1]} : vector<30x128xf32> to vector<3x128xf32>
    %18 = vector.extract_strided_slice %6 {offsets = [15, 0], sizes = [3, 128], strides = [1, 1]} : vector<30x128xf32> to vector<3x128xf32>
    %19 = vector.extract_strided_slice %5 {offsets = [18, 0], sizes = [3, 128], strides = [1, 1]} : vector<30x128xf32> to vector<3x128xf32>
    %20 = vector.extract_strided_slice %6 {offsets = [18, 0], sizes = [3, 128], strides = [1, 1]} : vector<30x128xf32> to vector<3x128xf32>
    %21 = vector.extract_strided_slice %5 {offsets = [21, 0], sizes = [3, 128], strides = [1, 1]} : vector<30x128xf32> to vector<3x128xf32>
    %22 = vector.extract_strided_slice %6 {offsets = [21, 0], sizes = [3, 128], strides = [1, 1]} : vector<30x128xf32> to vector<3x128xf32>
    %23 = vector.extract_strided_slice %5 {offsets = [24, 0], sizes = [3, 128], strides = [1, 1]} : vector<30x128xf32> to vector<3x128xf32>
    %24 = vector.extract_strided_slice %6 {offsets = [24, 0], sizes = [3, 128], strides = [1, 1]} : vector<30x128xf32> to vector<3x128xf32>
    %25 = vector.extract_strided_slice %5 {offsets = [27, 0], sizes = [3, 128], strides = [1, 1]} : vector<30x128xf32> to vector<3x128xf32>
    %26 = vector.extract_strided_slice %6 {offsets = [27, 0], sizes = [3, 128], strides = [1, 1]} : vector<30x128xf32> to vector<3x128xf32>
    %27 = tpu.concatenate %0, %7, %8, %9, %10, %11, %12, %13, %14, %15, %16, %17, %18, %19, %20, %21 in 0 : vector<3x128xf32>, vector<3x128xf32>, vector<3x128xf32>, vector<3x128xf32>, vector<3x128xf32>, vector<3x128xf32>, vector<3x128xf32>, vector<3x128xf32>, vector<3x128xf32>, vector<3x128xf32>, vector<3x128xf32>, vector<3x128xf32>, vector<3x128xf32>, vector<3x128xf32>, vector<3x128xf32>, vector<3x128xf32> -> vector<48x128xf32>
    %28 = tpu.concatenate %22, %23, %24, %25, %26 in 0 : vector<3x128xf32>, vector<3x128xf32>, vector<3x128xf32>, vector<3x128xf32>, vector<3x128xf32> -> vector<15x128xf32>
    %29 = tpu.concatenate %27, %28 in 0 : vector<48x128xf32>, vector<15x128xf32> -> vector<63x128xf32>
    %c0_3 = arith.constant 0 : index
    %c0_4 = arith.constant 0 : index
    %30 = vector.load %arg3[%c0_3, %c0_4] : memref<63x128xf32, #tpu.memory_space<vmem>>, vector<63x128xf32>
    tpu.vector_store %arg3[%c0_3, %c0_4], %29 {strides = array<i32>} : memref<63x128xf32, #tpu.memory_space<vmem>>, vector<63x128xf32>,
    return
  }
  func.func @transform_0(%arg0: i32) -> (i32, i32) {
    %c0_i32 = arith.constant 0 : i32
    %c0_i32_0 = arith.constant 0 : i32
    %c0_i32_1 = arith.constant 0 : i32
    return %c0_i32, %c0_i32_0 : i32, i32
  }
  func.func @transform_1(%arg0: i32) -> (i32, i32) {
    %c0_i32 = arith.constant 0 : i32
    %c0_i32_0 = arith.constant 0 : i32
    return %c0_i32, %arg0 : i32, i32
  }
  func.func @transform_2(%arg0: i32) -> (i32, i32) {
    %c0_i32 = arith.constant 0 : i32
    %c0_i32_0 = arith.constant 0 : i32
    return %c0_i32, %arg0 : i32, i32
  }
}

</mosaic_0001>

<bundles_post_ra>
// kernel: _embed_direct.1
= control target key start
LH: loop header
LB: loop body
LE: loop exit
PB: predicated region body
PF: predicated region fallthrough
CT: control target
= control target key end

     0   :  { %s1720_s9 = smov 0   ;;  %s1722_s10 = smov 0   ;;  %s2268_s0 = inlined_call_operand.vmem [shape: f32[30,1], index: 0, kind: input, shape index: {}]   ;;  %s2269_s1 = inlined_call_operand.vmem [shape: f32[3,384], index: 1, kind: input, shape index: {}]   ;;  %s2270_s2 = inlined_call_operand.vmem [shape: f32[300,63], index: 2, kind: output, shape index: {}]  }
   0x1   :  { %s1724_s11 = smov 0  }
   0x2 LB: > { %s1733_s12 = sadd.s32 4294967295, %s1664_s11   ;;  %s1735_s13 = sadd.s32 1, %s1664_s11   ;;  %s1664_s11 = sphi %s1724_s11, %s2289_s11   ;;  %s1660_s10 = sphi %s1722_s10, %s2288_s10   ;;  %s1656_s9 = sphi %s1720_s9, %s2287_s9  }
   0x3   : > { %s63_s14 = ssub.s32 %s1664_s11, %s1735_s13  ;;  %s66_s15 = sadd.s32 1, %s1660_s10 }
   0x4   : > { %p64_p0 = scmp.eq.s32.totalorder %s63_s14, 0  ;;  %p76_p1 = scmp.ne.s32.totalorder %s1660_s10, %s1656_s9 }
   0x5   : > { %p77_p2 = scmp.eq.s32.totalorder %s1733_s12, 2  ;;  %p1425_p3 = scmp.ge.s32.totalorder %s1664_s11, 1 }
   0x6   : > { %s1743_s16 = scalar_select %p64_p0, %s1660_s10, %s66_s15  }
   0x7   : > { %p1745_p4 = por %p77_p2, %p76_p1  ;;  %p111_p5 = scmp.lt.s32.totalorder %s1664_s11, 4 }
   0x9   : > { %p112_p6 = pnand %p1425_p3, %p111_p5 }
   0xa   : > { %v143_v0 = vld [vmem:[%s2268_s0 + $0x10] sm:$0xff] (!%p112_p6)  ;;  %v141_v1 = vld [vmem:[%s2268_s0] sm:$0xff] (!%p112_p6)  ;;  %v1698_v2 = vmov (!%p112_p6), 0   ;;  %v144_v3 = vld [vmem:[%s2268_s0 + $0x18] sm:$0x3f] (!%p112_p6)  ;;  %p131_p7 = scmp.lt.s32.totalorder (!%p112_p6), %s1733_s12, 2 }
   0xb   : > { %115 = sbr.rel (%p112_p6) target bundleno = 513 (0x201), region = 28  ;;  %1593 = vset.pattern.permute.xlu1 (!%p112_p6), %v1698_v2  ;;  %1592 = vset.pattern.permute.xlu0 (!%p112_p6), %v1698_v2  ;;  %v142_v4 = vld [vmem:[%s2268_s0 + $0x8] sm:$0xff] (!%p112_p6)  ;;  %vm2272_vm0 = vcmask (!%p112_p6), 1041408   ;;  %vm160_vm1 = vcmask (!%p112_p6), 1042432   ;;  %vm2271_vm2 = vcmask (!%p112_p6), 1044480   ;;  %vm162_vm3 = vcmask (!%p112_p6), 1045504  }
   0xc   : > { %186 = vperm.xlu1 (!%p112_p6), %1593, %v143_v0   ;;  %176 = vperm.xlu0 (!%p112_p6), %1592, %v141_v1   ;;  %vm164_vm4 = vcmask (!%p112_p6), 1040384   ;;  %vm166_vm5 = vcmask (!%p112_p6), 1043456   ;;  %v1699_v50 = vmov (!%p112_p6), 683565275   ;;  %v1700_v52 = vmov (!%p112_p6), 2475754826  }
   0xd   : > { %v1701_v54 = vmov (!%p112_p6), 2131351028   ;;  %v1702_v56 = vmov (!%p112_p6), 2102212464   ;;  %v1703_v58 = vmov (!%p112_p6), 920167782  }
   0xe   : > { %v1704_v2 = vmov (!%p112_p6), 1326507024   ;;  %vm168_vm12 = vcmask (!%p112_p6), 1046528   ;;  %s128_s3 = sand.u32 (!%p112_p6), 1, %s1656_s9  }
   0xf   : > { %s1426_s4 = sshll.u32 (!%p112_p6), %s128_s3, 7 }
  0x10   : > { %191 = vperm.xlu1 (!%p112_p6), %1593, %v144_v3   ;;  %181 = vperm.xlu0 (!%p112_p6), %1592, %v142_v4   ;;  %s2134_s5 = scalar_lea.vmem (!%p112_p6), [#allocation2], %s1426_s4  }
  0x12   : > { %s132_s26 = scalar_select %p131_p7, %s1733_s12, 2 }
  0x13   : > { %s1461_s6 = sshll.u32 (%p1745_p4), %s1733_s12, 4  ;;  %s1477_s7 = sshll.u32 (%p1745_p4), %s1733_s12, 7 }
  0x14   : > { %s1427_s27 = sshll.u32 %s132_s26, 2  ;;  %s1155_s8 = ssub.s32 (%p1745_p4), 38, %s1461_s6 }
  0x15   : > { %s134_s30 = scalar_lea.vmem %s2269_s1, %s1427_s27  ;;  %s2175_s14 = scalar_lea.vmem (%p1745_p4), %s2270_s2, %s1477_s7  }
  0x16   : > { %v1766_v5 = vld [vmem:[%s134_s30] sm:$0x7]  ;;  %p1156_p8 = scmp.lt.s32.totalorder (%p1745_p4), %s1155_s8, 16 }
  0x17   : > { %v154_v6 = vrot.slane %v1766_v5, 1  ;;  %v156_v7 = vrot.slane %v1766_v5, 6  ;;  %v146_v8 = vrot.slane %v1766_v5, 5  ;;  %v158_v9 = vrot.slane %v1766_v5, 3 }
  0x18   : > { %v148_v10 = vrot.slane %v1766_v5, 2  ;;  %v150_v26 = vrot.slane %v1766_v5, 7  ;;  %v152_v34 = vrot.slane %v1766_v5, 4 }
  0x19   : > { %v171_v11 = vsel %vm2272_vm0, %v154_v6, %v156_v7  ;;  %v161_v12 = vsel %vm160_vm1, %v1766_v5, %v146_v8 }
  0x1a   : > { %v173_v13 = vsel %vm2271_vm2, %v171_v11, %v158_v9  ;;  %v163_v14 = vsel %vm162_vm3, %v161_v12, %v148_v10  ;;  %v165_v35 = vsel %vm164_vm4, %v148_v10, %v150_v26 }
  0x1b   : > { %v1799_v44 = vsel %vm166_vm5, %v165_v35, %v152_v34 }
  0x8b   : > { %v187_v15 = vpop.permute.xlu1 %186  ;;  %v177_v16 = vpop.permute.xlu0 %176 }
  0x8c   : > { %v1780_v17 = vmul.f32 %v187_v15, %v173_v13  ;;  %v1782_v18 = vmul.f32 %v177_v16, %v163_v14 }
  0x8e   : > { %v406_v19 = vand.u32 2147483647, %v1780_v17  ;;  %v409_v20 = vand.u32 2139095040, %v1780_v17  ;;  %v198_v21 = vand.u32 2147483647, %v1782_v18  ;;  %v201_v22 = vand.u32 2139095040, %v1782_v18 }
  0x8f   : > { %v192_v23 = vpop.permute.xlu1 %191 }
  0x90   : > { %v410_v24 = vshrl.u32 %v409_v20, 23  ;;  %v1788_v25 = vmul.f32 %v192_v23, %v161_v12  ;;  %v413_v27 = vand.u32 8388607, %v406_v19  ;;  %v202_v28 = vshrl.u32 %v201_v22, 23 }
  0x91   : > { %v205_v29 = vand.u32 8388607, %v198_v21 }
  0x92   : > { %v1436_v30 = vadd.s32 4294967169, %v410_v24  ;;  %v1428_v31 = vadd.s32 4294967169, %v202_v28  ;;  %v513_v32 = vand.u32 2139095040, %v1788_v25  ;;  %v414_v36 = vor.u32 8388608, %v413_v27 }
  0x93   : > { %v206_v37 = vor.u32 8388608, %v205_v29  ;;  %vm512_vm0 = vcmp.lt.s32.totalorder %v1788_v25, 0 }
  0x94   : > { %v416_v33 = vadd.s32 1, %v1436_v30  ;;  %v208_v38 = vadd.s32 1, %v1428_v31  ;;  %v514_v39 = vshrl.u32 %v513_v32, 23  ;;  %v1801_v45 = vshll.u32 %v414_v36, 8 }
  0x95   : > { %v1805_v47 = vshll.u32 %v206_v37, 8 }
  0x96   : > { %vm417_vm6 = vcmp.gt.s32.totalorder %v416_v33, 0  ;;  %vm209_vm7 = vcmp.gt.s32.totalorder %v208_v38, 0  ;;  %v1440_v48 = vadd.s32 4294967169, %v514_v39 }
  0x97   : > { %v418_v40 = vsel %vm417_vm6, %v416_v33, 0  ;;  %v210_v43 = vsel %vm209_vm7, %v208_v38, 0 }
  0x98   : > { %v419_v41 = vshrl.u32 %v418_v40, 5  ;;  %v420_v42 = vand.u32 31, %v418_v40  ;;  %v1803_v46 = vand.u32 31, %v210_v43  ;;  %v1812_v60 = vshrl.u32 %v210_v43, 5 }
  0x99   : > { %v520_v12 = vadd.s32 1, %v1440_v48 }
  0x9a   : > { %v421_v49 = vsub.s32 32, %v420_v42  ;;  %v423_v51 = vshll.u32 %v1699_v50, %v420_v42  ;;  %v426_v53 = vshll.u32 %v1700_v52, %v420_v42  ;;  %v429_v55 = vshll.u32 %v1701_v54, %v420_v42 }
  0x9b   : > { %v432_v57 = vshll.u32 %v1702_v56, %v420_v42  ;;  %v435_v59 = vshll.u32 %v1703_v58, %v420_v42  ;;  %vm438_vm8 = vcmp.lt.s32.totalorder %v419_v41, 1  ;;  %vm440_vm9 = vcmp.lt.s32.totalorder %v419_v41, 3 }
  0x9c   : > { %v422_v61 = vshrl.u32 %v1699_v50, %v421_v49  ;;  %v424_v62 = vshrl.u32 %v1700_v52, %v421_v49  ;;  %v427_v63 = vshrl.u32 %v1701_v54, %v421_v49  ;;  %v430_v0 = vshrl.u32 %v1702_v56, %v421_v49 }
  0x9d   : > { %v433_v1 = vshrl.u32 %v1703_v58, %v421_v49  ;;  %v436_v3 = vshrl.u32 %v1704_v2, %v421_v49  ;;  %vm441_vm10 = vcmp.lt.s32.totalorder %v419_v41, 4  ;;  %v213_v9 = vsub.s32 32, %v1803_v46 }
  0x9e   : > { %v425_v4 = vor.u32 %v424_v62, %v423_v51  ;;  %v428_v7 = vor.u32 %v427_v63, %v426_v53  ;;  %v431_v8 = vor.u32 %v430_v0, %v429_v55  ;;  %vm439_vm11 = vcmp.lt.s32.totalorder %v419_v41, 2 }
  0x9f   : > { %v434_v10 = vor.u32 %v433_v1, %v432_v57  ;;  %v437_v11 = vor.u32 %v436_v3, %v435_v59  ;;  %v215_v24 = vshll.u32 %v1699_v50, %v1803_v46  ;;  %v216_v28 = vshrl.u32 %v1700_v52, %v213_v9 }
  0xa0   : > { %v442_v13 = vsel %vm438_vm8, %v422_v61, %v425_v4  ;;  %v443_v14 = vsel %vm441_vm10, %v431_v8, 2102212464  ;;  %v446_v15 = vsel %vm438_vm8, %v425_v4, %v428_v7  ;;  %v450_v16 = vsel %vm438_vm8, %v428_v7, %v431_v8 }
  0xa1   : > { %v444_v20 = vsel %vm440_vm9, %v428_v7, %v443_v14  ;;  %v447_v22 = vsel %vm441_vm10, %v434_v10, 920167782  ;;  %v451_v23 = vsel %vm441_vm10, %v437_v11, 1326507024  ;;  %v218_v29 = vshll.u32 %v1700_v52, %v1803_v46 }
  0xa2   : > { %v448_v26 = vsel %vm440_vm9, %v431_v8, %v447_v22  ;;  %v452_v27 = vsel %vm440_vm9, %v434_v10, %v451_v23  ;;  %v445_v30 = vsel %vm439_vm11, %v442_v13, %v444_v20  ;;  %v219_v33 = vshrl.u32 %v1701_v54, %v213_v9  ;;  %v182_v23 = vpop.permute.xlu0 %181 }
  0xa3   : > { %v449_v31 = vsel %vm439_vm11, %v446_v15, %v448_v26  ;;  %v453_v32 = vsel %vm439_vm11, %v450_v16, %v452_v27  ;;  %v217_v38 = vor.u32 %v216_v28, %v215_v24  ;;  %v221_v40 = vshll.u32 %v1701_v54, %v1803_v46 }
  0xa4   : > { %v1837_v34 = vmul.u32.u64.low %v1801_v45, %v453_v32  ;;  %v1838_v35 = vmul.u32.u64.high %v1801_v45, %v453_v32, %v1837_v34  ;;  %v1841_v36 = vmul.u32.u64.low %v1801_v45, %v449_v31  ;;  %v1842_v37 = vmul.u32.u64.high %v1801_v45, %v449_v31, %v1841_v36 }
  0xa5   : > { %v220_v39 = vor.u32 %v219_v33, %v218_v29  ;;  %v222_v41 = vshrl.u32 %v1702_v56, %v213_v9  ;;  %v214_v42 = vshrl.u32 %v1699_v50, %v213_v9  ;;  %v224_v43 = vshll.u32 %v1702_v56, %v1803_v46 }
  0xa6   : > { %v225_v48 = vshrl.u32 %v1703_v58, %v213_v9  ;;  %v228_v49 = vshrl.u32 %v1704_v2, %v213_v9  ;;  %v461_v51 = vmul.u32 %v1801_v45, %v445_v30  ;;  %v227_v55 = vshll.u32 %v1703_v58, %v1803_v46 }
  0xa7   : > { %v223_v53 = vor.u32 %v222_v41, %v221_v40  ;;  %vm230_vm13 = vcmp.lt.s32.totalorder %v1812_v60, 1  ;;  %vm463_vm14 = vc.u32 %v1838_v35, %v1841_v36  ;;  %v464_v57 = vadd.s32 1, %v1842_v37 }
  0xa8   : > { %v226_v59 = vor.u32 %v225_v48, %v224_v43  ;;  %vm231_vm15 = vcmp.lt.s32.totalorder %v1812_v60, 2  ;;  %v229_v61 = vor.u32 %v228_v49, %v227_v55  ;;  %vm232_vm6 = vcmp.lt.s32.totalorder %v1812_v60, 3 }
  0xa9   : > { %vm233_vm7 = vcmp.lt.s32.totalorder %v1812_v60, 4  ;;  %v238_v45 = vsel %vm230_vm13, %v217_v38, %v220_v39  ;;  %v465_v62 = vsel %vm463_vm14, %v464_v57, %v1842_v37  ;;  %v242_v0 = vsel %vm230_vm13, %v220_v39, %v223_v53 }
  0xaa   : > { %v235_v63 = vsel %vm233_vm7, %v223_v53, 2102212464  ;;  %v239_v46 = vsel %vm233_vm7, %v226_v59, 920167782  ;;  %v466_v1 = vadd.s32 %v465_v62, %v461_v51  ;;  %v234_v3 = vsel %vm230_vm13, %v214_v42, %v217_v38 }
  0xab   : > { %v240_v4 = vsel %vm232_vm6, %v223_v53, %v239_v46  ;;  %v243_v7 = vsel %vm233_vm7, %v229_v61, 1326507024  ;;  %v236_v8 = vsel %vm232_vm6, %v220_v39, %v235_v63  ;;  %vm521_vm8 = vcmp.gt.s32.totalorder %v520_v12, 0 }
  0xac   : > { %v241_v9 = vsel %vm231_vm15, %v238_v45, %v240_v4  ;;  %v244_v10 = vsel %vm232_vm6, %v226_v59, %v243_v7  ;;  %v467_v11 = vadd.s32 536870912, %v466_v1  ;;  %v522_v22 = vsel %vm521_vm8, %v520_v12, 0 }
  0xad   : > { %v245_v13 = vsel %vm231_vm15, %v242_v0, %v244_v10  ;;  %v1869_v14 = vmul.u32.u64.low %v1805_v47, %v241_v9  ;;  %v1870_v15 = vmul.u32.u64.high %v1805_v47, %v241_v9, %v1869_v14  ;;  %v169_v24 = vsel %vm168_vm12, %v1799_v44, %v154_v6 }
  0xae   : > { %v1874_v16 = vmul.u32.u64.low %v1805_v47, %v245_v13  ;;  %v1875_v20 = vmul.u32.u64.high %v1805_v47, %v245_v13, %v1874_v16  ;;  %v1881_v26 = vshrl.u32 %v467_v11, 30  ;;  %v237_v27 = vsel %vm231_vm15, %v234_v3, %v236_v8 }
  0xaf   : > { %v524_v28 = vand.u32 31, %v522_v22  ;;  %v510_v29 = vand.u32 2147483647, %v1788_v25  ;;  %v256_v31 = vadd.s32 1, %v1870_v15  ;;  %v1888_v12 = vmul.f32 %v182_v23, %v169_v24 }
  0xb0   : > { %v469_v30 = vshll.u32 %v1881_v26, 30  ;;  %v253_v33 = vmul.u32 %v1805_v47, %v237_v27  ;;  %vm255_vm9 = vc.u32 %v1875_v20, %v1869_v14  ;;  %v523_v41 = vshrl.u32 %v522_v22, 5 }
  0xb1   : > { %v525_v32 = vsub.s32 32, %v524_v28  ;;  %v527_v6 = vshll.u32 %v1699_v50, %v524_v28  ;;  %v530_v44 = vshll.u32 %v1700_v52, %v524_v28  ;;  %v257_v34 = vsel %vm255_vm9, %v256_v31, %v1870_v15 }
  0xb2   : > { %v1895_v60 = vsub.s32 %v466_v1, %v469_v30  ;;  %v258_v37 = vadd.s32 %v257_v34, %v253_v33  ;;  %v517_v38 = vand.u32 8388607, %v510_v29  ;;  %v533_v42 = vshll.u32 %v1701_v54, %v524_v28 }
  0xb3   : > { %v528_v39 = vshrl.u32 %v1700_v52, %v525_v32  ;;  %v531_v40 = vshrl.u32 %v1701_v54, %v525_v32  ;;  %v305_v43 = vand.u32 2139095040, %v1888_v12  ;;  %v534_v53 = vshrl.u32 %v1702_v56, %v525_v32 }
  0xb4   : > { %v472_v47 = vsub.s32 0, %v1895_v60  ;;  %v259_v48 = vadd.s32 536870912, %v258_v37  ;;  %v526_v57 = vshrl.u32 %v1699_v50, %v525_v32  ;;  %v536_v59 = vshll.u32 %v1702_v56, %v524_v28 }
  0xb5   : > { %v529_v49 = vor.u32 %v528_v39, %v527_v6  ;;  %v532_v51 = vor.u32 %v531_v40, %v530_v44  ;;  %v537_v61 = vshrl.u32 %v1703_v58, %v525_v32  ;;  %v535_v62 = vor.u32 %v534_v53, %v533_v42 }
  0xb6   : > { %v1437_v55 = vmin.u32 %v472_v47, %v1895_v60  ;;  %v1910_v45 = vshrl.u32 %v259_v48, 30  ;;  %v539_v63 = vshll.u32 %v1703_v58, %v524_v28  ;;  %v540_v46 = vshrl.u32 %v1704_v2, %v525_v32 }
  0xb7   : > { %v518_v1 = vor.u32 8388608, %v517_v38  ;;  %v538_v3 = vor.u32 %v537_v61, %v536_v59  ;;  %vm542_vm10 = vcmp.lt.s32.totalorder %v523_v41, 1  ;;  %vm543_vm11 = vcmp.lt.s32.totalorder %v523_v41, 2 }
  0xb8   : > { %v474_v0 = vclz %v1437_v55  ;;  %v261_v4 = vshll.u32 %v1910_v45, 30  ;;  %v541_v7 = vor.u32 %v540_v46, %v539_v63  ;;  %vm544_vm13 = vcmp.lt.s32.totalorder %v523_v41, 3 }
  0xb9   : > { %vm545_vm14 = vcmp.lt.s32.totalorder %v523_v41, 4  ;;  %v546_v9 = vsel %vm542_vm10, %v526_v57, %v529_v49  ;;  %v550_v10 = vsel %vm542_vm10, %v529_v49, %v532_v51  ;;  %v306_v16 = vshrl.u32 %v305_v43, 23 }
  0xba   : > { %v1438_v8 = vadd.s32 4294967294, %v474_v0  ;;  %v262_v11 = vsub.s32 %v258_v37, %v261_v4  ;;  %v547_v13 = vsel %vm545_vm14, %v535_v62, 2102212464  ;;  %v551_v15 = vsel %vm545_vm14, %v538_v3, 920167782 }
  0xbb   : > { %v548_v22 = vsel %vm544_vm13, %v532_v51, %v547_v13  ;;  %v552_v23 = vsel %vm544_vm13, %v535_v62, %v551_v15  ;;  %v558_v33 = vshll.u32 %v518_v1, 8  ;;  %v554_v44 = vsel %vm542_vm10, %v532_v51, %v535_v62 }
  0xbc   : > { %vm1439_vm15 = vcmp.lt.s32.totalorder %v1438_v8, 0  ;;  %v264_v27 = vsub.s32 0, %v262_v11  ;;  %v549_v28 = vsel %vm543_vm11, %v546_v9, %v548_v22  ;;  %v553_v32 = vsel %vm543_vm11, %v550_v10, %v552_v23 }
  0xbd   : > { %v477_v24 = vsel %vm1439_vm15, 0, %v1438_v8  ;;  %v555_v34 = vsel %vm545_vm14, %v541_v7, 1326507024  ;;  %v1432_v37 = vadd.s32 4294967169, %v306_v16  ;;  %v462_v38 = vadd.s32 %v1841_v36, %v1838_v35 }
  0xbe   : > { %v478_v30 = vsub.s32 32, %v477_v24  ;;  %v482_v31 = vsub.s32 4294967266, %v477_v24  ;;  %v1429_v6 = vmin.u32 %v264_v27, %v262_v11  ;;  %v556_v40 = vsel %vm544_vm13, %v538_v3, %v555_v34 }
  0xbf   : > { %v302_v47 = vand.u32 2147483647, %v1888_v12  ;;  %v557_v43 = vsel %vm543_vm11, %v554_v44, %v556_v40  ;;  %v1930_v48 = vmul.u32.u64.low %v558_v33, %v553_v32  ;;  %v1931_v49 = vmul.u32.u64.high %v558_v33, %v553_v32, %v1930_v48 }
  0xc0   : > { %v483_v39 = vadd.s32 127, %v482_v31  ;;  %v266_v42 = vclz %v1429_v6  ;;  %v480_v53 = vshrl.u32 %v462_v38, %v478_v30  ;;  %vm200_vm6 = vcmp.lt.s32.totalorder %v1782_v18, 0 }
  0xc1   : > { %v1933_v51 = vmul.u32.u64.low %v558_v33, %v557_v43  ;;  %v1934_v57 = vmul.u32.u64.high %v558_v33, %v557_v43, %v1933_v51  ;;  %v312_v35 = vadd.s32 1, %v1432_v37  ;;  %v479_v36 = vshll.u32 %v1895_v60, %v477_v24 }
  0xc2   : > { %v484_v55 = vshll.u32 %v483_v39, 23  ;;  %v1430_v59 = vadd.s32 4294967294, %v266_v42  ;;  %v284_v62 = vsub.s32 4, %v1910_v45  ;;  %v309_v41 = vand.u32 8388607, %v302_v47 }
  0xc3   : > { %v565_v63 = vmul.u32 %v558_v33, %v549_v28  ;;  %v568_v46 = vadd.s32 1, %v1931_v49  ;;  %vm313_vm8 = vcmp.gt.s32.totalorder %v312_v35, 0  ;;  %v481_v0 = vor.u32 %v480_v53, %v479_v36 }
  0xc4   : > { %v485_v61 = vor.u32 4788187, %v484_v55  ;;  %vm1431_vm7 = vcmp.lt.s32.totalorder %v1430_v59, 0  ;;  %v1943_v3 = vadd.s32 %v1930_v48, %v1934_v57  ;;  %vm567_vm9 = vc.u32 %v1934_v57, %v1930_v48 }
  0xc5   : > { %v269_v1 = vsel %vm1431_vm7, 0, %v1430_v59  ;;  %v254_v60 = vadd.s32 %v1869_v14, %v1875_v20  ;;  %v569_v8 = vsel %vm567_vm9, %v568_v46, %v1931_v49  ;;  %v285_v10 = vsel %vm200_vm6, %v284_v62, %v1910_v45 }
  0xc6   : > { %v270_v4 = vsub.s32 32, %v269_v1  ;;  %v274_v7 = vsub.s32 4294967266, %v269_v1  ;;  %v486_v9 = vand.u32 2147483647, %v485_v61  ;;  %v570_v13 = vadd.s32 %v569_v8, %v565_v63 }
  0xc7   : > { %v314_v15 = vsel %vm313_vm8, %v312_v35, 0  ;;  %v271_v16 = vshll.u32 %v262_v11, %v269_v1  ;;  %v488_v27 = vcvt.s32.f32 %v481_v0  ;;  %vm1954_vm10 = vcmp.le.f32.partialorder %v198_v21, 0.7853982 }
  0xc8   : > { %v272_v22 = vshrl.u32 %v254_v60, %v270_v4  ;;  %v275_v23 = vadd.s32 127, %v274_v7  ;;  %v316_v24 = vand.u32 31, %v314_v15  ;;  %v571_v20 = vadd.s32 536870912, %v570_v13 }
  0xc9   : > { %v1960_v31 = vsel %vm1954_vm10, 0, %v285_v10  ;;  %v489_v32 = vmul.f32 %v488_v27, %v486_v9  ;;  %vm408_vm11 = vcmp.lt.s32.totalorder %v1780_v17, 0  ;;  %v310_v6 = vor.u32 8388608, %v309_v41 }
  0xca   : > { %v273_v28 = vor.u32 %v272_v22, %v271_v16  ;;  %v276_v30 = vshll.u32 %v275_v23, 23  ;;  %v317_v45 = vsub.s32 32, %v316_v24  ;;  %v1962_v11 = vshrl.u32 %v571_v20, 30 }
  0xcb   : > { %v291_v21 = vadd.s32 3, %v1960_v31  ;;  %v319_v34 = vshll.u32 %v1699_v50, %v316_v24  ;;  %v490_v43 = vxor.u32 2147483648, %v489_v32  ;;  %v322_v49 = vshll.u32 %v1700_v52, %v316_v24 }
  0xcc   : > { %v277_v33 = vor.u32 4788187, %v276_v30  ;;  %v573_v44 = vshll.u32 %v1962_v11, 30  ;;  %v320_v37 = vshrl.u32 %v1700_v52, %v317_v45  ;;  %v280_v39 = vcvt.s32.f32 %v273_v28 }
  0xcd   : > { %v323_v40 = vshrl.u32 %v1701_v54, %v317_v45  ;;  %v326_v42 = vshrl.u32 %v1702_v56, %v317_v45  ;;  %v325_v53 = vshll.u32 %v1701_v54, %v316_v24  ;;  %v315_v51 = vshrl.u32 %v314_v15, 5 }
  0xce   : > { %v278_v38 = vand.u32 2147483647, %v277_v33  ;;  %v574_v48 = vsub.s32 %v570_v13, %v573_v44  ;;  %v321_v57 = vor.u32 %v320_v37, %v319_v34  ;;  %v328_v59 = vshll.u32 %v1702_v56, %v316_v24 }
  0xcf   : > { %v324_v36 = vor.u32 %v323_v40, %v322_v49  ;;  %v327_v61 = vor.u32 %v326_v42, %v325_v53  ;;  %v329_v62 = vshrl.u32 %v1703_v58, %v317_v45  ;;  %v331_v63 = vshll.u32 %v1703_v58, %v316_v24 }
  0xd0   : > { %v281_v55 = vmul.f32 %v280_v39, %v278_v38  ;;  %v576_v35 = vsub.s32 0, %v574_v48  ;;  %v332_v46 = vshrl.u32 %v1704_v2, %v317_v45  ;;  %v1977_v0 = vshll.u32 %v310_v6, 8 }
  0xd1   : > { %v491_v52 = vsel %vm408_vm11, %v490_v43, %v489_v32  ;;  %v318_v1 = vshrl.u32 %v1699_v50, %v317_v45  ;;  %v330_v60 = vor.u32 %v329_v62, %v328_v59  ;;  %vm334_vm13 = vcmp.lt.s32.totalorder %v315_v51, 1 }
  0xd2   : > { %v282_v41 = vxor.u32 2147483648, %v281_v55  ;;  %v1441_v54 = vmin.u32 %v576_v35, %v574_v48  ;;  %v333_v4 = vor.u32 %v332_v46, %v331_v63  ;;  %vm337_vm14 = vcmp.lt.s32.totalorder %v315_v51, 4 }
  0xd3   : > { %v339_v7 = vsel %vm337_vm14, %v327_v61, 2102212464  ;;  %v342_v8 = vsel %vm334_vm13, %v321_v57, %v324_v36  ;;  %vm335_vm15 = vcmp.lt.s32.totalorder %v315_v51, 2  ;;  %vm336_vm7 = vcmp.lt.s32.totalorder %v315_v51, 3 }
  0xd4   : > { %v283_v56 = vsel %vm200_vm6, %v282_v41, %v281_v55  ;;  %v578_v2 = vclz %v1441_v54  ;;  %v343_v50 = vsel %vm337_vm14, %v330_v60, 920167782  ;;  %v346_v13 = vsel %vm334_vm13, %v324_v36, %v327_v61 }
  0xd5   : > { %v286_v58 = vsel %vm1954_vm10, %v1782_v18, %v283_v56  ;;  %v344_v10 = vsel %vm336_vm7, %v327_v61, %v343_v50  ;;  %v338_v15 = vsel %vm334_vm13, %v318_v1, %v321_v57  ;;  %v340_v16 = vsel %vm336_vm7, %v324_v36, %v339_v7 }
  0xd6   : > { %1594 = vcosq.f32 %v286_v58  ;;  %v1442_v9 = vadd.s32 4294967294, %v578_v2  ;;  %v345_v22 = vsel %vm335_vm15, %v342_v8, %v344_v10  ;;  %v347_v23 = vsel %vm337_vm14, %v333_v4, 1326507024 }
  0xd7   : > { %1596 = vsinq.f32 %v286_v58  ;;  %v348_v24 = vsel %vm336_vm7, %v330_v60, %v347_v23  ;;  %v1992_v27 = vmul.u32.u64.low %v1977_v0, %v345_v22  ;;  %v1993_v14 = vmul.u32.u64.high %v1977_v0, %v345_v22, %v1992_v27 }
  0xd8   : > { %vm1443_vm6 = vcmp.lt.s32.totalorder %v1442_v9, 0  ;;  %v292_v20 = vand.u32 3, %v291_v21  ;;  %v349_v30 = vsel %vm335_vm15, %v346_v13, %v348_v24  ;;  %vm1999_vm8 = vcmp.le.f32.partialorder %v406_v19, 0.7853982 }
  0xd9   : > { %v581_v28 = vsel %vm1443_vm6, 0, %v1442_v9  ;;  %v707_v6 = vand.u32 3, %v1960_v31  ;;  %v494_v44 = vsel %vm1999_vm8, %v1780_v17, %v491_v52  ;;  %v341_v34 = vsel %vm335_vm15, %v338_v15, %v340_v16 }
  0xda   : > { %v582_v32 = vsub.s32 32, %v581_v28  ;;  %v586_v33 = vsub.s32 4294967266, %v581_v28  ;;  %v2009_v21 = vmul.u32.u64.low %v1977_v0, %v349_v30  ;;  %v2010_v37 = vmul.u32.u64.high %v1977_v0, %v349_v30, %v2009_v21 }
  0xdb   : > { %v583_v38 = vshll.u32 %v574_v48, %v581_v28  ;;  %v360_v40 = vadd.s32 1, %v1993_v14  ;;  %v492_v42 = vsub.s32 4, %v1881_v26  ;;  %vm290_vm9 = vweird.f32 %v1782_v18 }
  0xdc   : > { %v584_v19 = vshrl.u32 %v1943_v3, %v582_v32  ;;  %v587_v39 = vadd.s32 127, %v586_v33  ;;  %vm293_vm10 = vcmp.lt.s32.totalorder %v292_v20, 2  ;;  %vm294_vm13 = vcmp.eq.s32.totalorder %v292_v20, 0 }
  0xdd   : > { %vm297_vm14 = vcmp.eq.s32.totalorder %v292_v20, 2  ;;  %1598 = vcosq.f32 %v494_v44  ;;  %v357_v53 = vmul.u32 %v1977_v0, %v341_v34  ;;  %vm359_vm15 = vc.u32 %v2010_v37, %v1992_v27 }
  0xde   : > { %v585_v31 = vor.u32 %v584_v19, %v583_v38  ;;  %v588_v43 = vshll.u32 %v587_v39, 23  ;;  %vm709_vm7 = vcmp.eq.s32.totalorder %v707_v6, 0  ;;  %1600 = vsinq.f32 %v494_v44 }
  0xdf   : > { %v361_v55 = vsel %vm359_vm15, %v360_v40, %v1993_v14  ;;  %v596_v57 = vsub.s32 4, %v1962_v11  ;;  %vm712_vm6 = vcmp.eq.s32.totalorder %v707_v6, 2  ;;  %vm708_vm2 = vcmp.lt.s32.totalorder %v707_v6, 2 }
  0xe0   : > { %v1595_v49 = vpop.eup %1594  ;;  %v589_v48 = vor.u32 4788187, %v588_v43  ;;  %v362_v59 = vadd.s32 %v361_v55, %v357_v53  ;;  %v592_v61 = vcvt.s32.f32 %v585_v31  ;;  %v493_v2 = vsel %vm408_vm11, %v492_v42, %v1881_v26 }
  0xe1   : > { %v1597_v3 = vpop.eup %1596  ;;  %v298_v51 = vxor.u32 2147483648, %v1595_v49  ;;  %v597_v60 = vsel %vm512_vm0, %v596_v57, %v1962_v11  ;;  %v2053_v16 = vsel %vm1999_vm8, 0, %v493_v2  ;;  %vm498_vm8 = vweird.f32 %v1780_v17 }
  0xe2   : > { %v295_v35 = vxor.u32 2147483648, %v1597_v3  ;;  %v590_v36 = vand.u32 2147483647, %v589_v48  ;;  %v363_v63 = vadd.s32 536870912, %v362_v59  ;;  %v913_v30 = vand.u32 3, %v2053_v16 }
  0xe3   : > { %v299_v62 = vsel %vm297_vm14, %v298_v51, %v1597_v3  ;;  %v714_v41 = vsel %vm712_vm6, %v298_v51, %v1597_v3  ;;  %v358_v31 = vadd.s32 %v1992_v27, %v2010_v37 }
  0xe4   : > { %v296_v46 = vsel %vm294_vm13, %v1595_v49, %v295_v35  ;;  %v711_v0 = vsel %vm709_vm7, %v1595_v49, %v295_v35  ;;  %v593_v52 = vmul.f32 %v592_v61, %v590_v36  ;;  %v2027_v56 = vshrl.u32 %v363_v63, 30 }
  0xe5   : > { %v300_v54 = vsel %vm293_vm10, %v296_v46, %v299_v62  ;;  %v715_v1 = vsel %vm708_vm2, %v711_v0, %v714_v41  ;;  %vm511_vm2 = vcmp.le.f32.partialorder %v510_v29, 0.7853982  ;;  %vm918_vm11 = vcmp.eq.s32.totalorder %v913_v30, 2 }
  0xe6   : > { %v2031_v4 = vsel %vm290_vm9, nan, %v300_v54  ;;  %v2035_v58 = vsel %vm290_vm9, nan, %v715_v1  ;;  %v594_v7 = vxor.u32 2147483648, %v593_v52  ;;  %v365_v11 = vshll.u32 %v2027_v56, 30 }
  0xe7   : > { %v1027_v8 = vrot.slane %v2031_v4, 5  ;;  %v1030_v50 = vrot.slane %v2035_v58, 2  ;;  %v1032_v9 = vrot.slane %v2031_v4, 2  ;;  %v599_v18 = vsel %vm511_vm2, 0, %v597_v60  ;;  %v2049_v26 = vpop.eup %1598 }
  0xe8   : > { %v595_v10 = vsel %vm512_vm0, %v594_v7, %v593_v52  ;;  %v1034_v15 = vrot.slane %v2035_v58, 7  ;;  %v366_v29 = vsub.s32 %v362_v59, %v365_v11  ;;  %v2057_v24 = vpop.eup %1600  ;;  %v1037_v28 = vrot.slane %v2031_v4, 7 }
  0xe9   : > { %v1067_v13 = vsel %vm160_vm1, %v1766_v5, %v1027_v8  ;;  %v598_v22 = vsel %vm511_vm2, %v1788_v25, %v595_v10  ;;  %v1069_v14 = vsel %vm164_vm4, %v1030_v50, %v1032_v9  ;;  %v603_v5 = vadd.s32 3, %v599_v18 }
  0xea   : > { %v1068_v23 = vsel %vm162_vm3, %v1067_v13, %v1030_v50  ;;  %1602 = vcosq.f32 %v598_v22  ;;  %v368_v20 = vsub.s32 0, %v366_v29  ;;  %v1070_v45 = vsel %vm166_vm5, %v1069_v14, %v1034_v15 }
  0xeb   : > { %1098 = vxpose.xlu0.b32.start [1/8] (short) %v1068_v23, 128  ;;  %1604 = vsinq.f32 %v598_v22  ;;  %v1071_v33 = vsel %vm168_vm12, %v1070_v45, %v1037_v28  ;;  %v503_v6 = vxor.u32 2147483648, %v2057_v24  ;;  %v506_v44 = vxor.u32 2147483648, %v2049_v26 }
  0xec   : > { %v1433_v32 = vmin.u32 %v368_v20, %v366_v29  ;;  %v604_v34 = vand.u32 3, %v603_v5  ;;  %vm915_vm0 = vcmp.eq.s32.totalorder %v913_v30, 0  ;;  %v1016_v40 = vand.u32 3, %v599_v18 }
  0xed   : > { %v917_v19 = vsel %vm915_vm0, %v2049_v26, %v503_v6  ;;  %v920_v39 = vsel %vm918_vm11, %v506_v44, %v2057_v24  ;;  %vm914_vm10 = vcmp.lt.s32.totalorder %v913_v30, 2  ;;  %vm602_vm13 = vweird.f32 %v1788_v25 }
  0xee   : > { %v370_v21 = vclz %v1433_v32  ;;  %vm605_vm14 = vcmp.lt.s32.totalorder %v604_v34, 2  ;;  %v921_v49 = vsel %vm914_vm10, %v917_v19, %v920_v39  ;;  %vm606_vm15 = vcmp.eq.s32.totalorder %v604_v34, 0 }
  0xef   : > { %1099 = vxpose.xlu0.b32.cont [2/8] (short) %v1071_v33, 128  ;;  %vm609_vm7 = vcmp.eq.s32.totalorder %v604_v34, 2  ;;  %vm1018_vm6 = vcmp.eq.s32.totalorder %v1016_v40, 0  ;;  %vm1021_vm2 = vcmp.eq.s32.totalorder %v1016_v40, 2  ;;  %v2080_v62 = vsel %vm498_vm8, nan, %v921_v49 }
  0xf0   : > { %v1434_v38 = vadd.s32 4294967294, %v370_v21  ;;  %vm1017_vm0 = vcmp.lt.s32.totalorder %v1016_v40, 2  ;;  %v1081_v60 = vrot.slane %v2080_v62, 5  ;;  %v388_v25 = vsub.s32 4, %v2027_v56 }
  0xf1   : > { %v499_v23 = vadd.s32 3, %v2053_v16  ;;  %vm304_vm11 = vcmp.lt.s32.totalorder %v1888_v12, 0 }
  0xf2   : > { %vm1435_vm9 = vcmp.lt.s32.totalorder %v1434_v38, 0  ;;  %v389_v5 = vsel %vm304_vm11, %v388_v25, %v2027_v56 }
  0xf3   : > { %v373_v43 = vsel %vm1435_vm9, 0, %v1434_v38  ;;  %vm303_vm9 = vcmp.le.f32.partialorder %v302_v47, 0.7853982  ;;  %v500_v30 = vand.u32 3, %v499_v23 }
  0xf4   : > { %v1603_v42 = vpop.eup %1602  ;;  %v374_v3 = vsub.s32 32, %v373_v43  ;;  %v378_v48 = vsub.s32 4294967266, %v373_v43  ;;  %v375_v51 = vshll.u32 %v366_v29, %v373_v43  ;;  %v391_v45 = vsel %vm303_vm9, 0, %v389_v5 }
  0xf5   : > { %v1605_v53 = vpop.eup %1604  ;;  %v610_v55 = vxor.u32 2147483648, %v1603_v42  ;;  %v395_v32 = vadd.s32 3, %v391_v45  ;;  %vm502_vm10 = vcmp.eq.s32.totalorder %v500_v30, 0  ;;  %v810_v34 = vand.u32 3, %v391_v45 }
  0xf6   : > { %v607_v57 = vxor.u32 2147483648, %v1605_v53  ;;  %v376_v59 = vshrl.u32 %v358_v31, %v374_v3  ;;  %v379_v35 = vadd.s32 127, %v378_v48  ;;  %v504_v16 = vsel %vm502_vm10, %v2049_v26, %v503_v6 }
  0xf7   : > { %v611_v36 = vsel %vm609_vm7, %v610_v55, %v1605_v53  ;;  %v1023_v61 = vsel %vm1021_vm2, %v610_v55, %v1605_v53  ;;  %v396_v33 = vand.u32 3, %v395_v32  ;;  %vm815_vm7 = vcmp.eq.s32.totalorder %v810_v34, 2 }
  0xf8   : > { %v608_v27 = vsel %vm606_vm15, %v1603_v42, %v607_v57  ;;  %v1020_v37 = vsel %vm1018_vm6, %v1603_v42, %v607_v57  ;;  %v377_v41 = vor.u32 %v376_v59, %v375_v51  ;;  %v380_v63 = vshll.u32 %v379_v35, 23 }
  0xf9   : > { %v612_v46 = vsel %vm605_vm14, %v608_v27, %v611_v36  ;;  %v1024_v0 = vsel %vm1017_vm0, %v1020_v37, %v1023_v61  ;;  %vm501_vm14 = vcmp.lt.s32.totalorder %v500_v30, 2  ;;  %vm401_vm15 = vcmp.eq.s32.totalorder %v396_v33, 2 }
  0xfa   : > { %v613_v52 = vsel %vm602_vm13, nan, %v612_v46  ;;  %v1025_v54 = vsel %vm602_vm13, nan, %v1024_v0  ;;  %v381_v1 = vor.u32 4788187, %v380_v63  ;;  %v384_v9 = vcvt.s32.f32 %v377_v41 }
  0xfb   : > { %v1084_v2 = vrot.slane %v613_v52, 5  ;;  %v1087_v7 = vrot.slane %v1025_v54, 2  ;;  %v1089_v8 = vrot.slane %v613_v52, 2  ;;  %v1091_v50 = vrot.slane %v1025_v54, 7 }
  0xfc   : > { %v382_v11 = vand.u32 2147483647, %v381_v1  ;;  %vm505_vm13 = vcmp.eq.s32.totalorder %v500_v30, 2  ;;  %vm398_vm6 = vcmp.eq.s32.totalorder %v396_v33, 0  ;;  %vm812_vm2 = vcmp.eq.s32.totalorder %v810_v34, 0 }
  0xfd   : > { %v1093_v10 = vsel %vm160_vm1, %v1081_v60, %v1084_v2  ;;  %v1095_v13 = vsel %vm164_vm4, %v1087_v7, %v1089_v8  ;;  %v507_v47 = vsel %vm505_vm13, %v506_v44, %v2057_v24  ;;  %vm397_vm0 = vcmp.lt.s32.totalorder %v396_v33, 2 }
  0xfe   : > { %v2090_v18 = vsel %vm162_vm3, %v1093_v10, %v1087_v7  ;;  %v385_v15 = vmul.f32 %v384_v9, %v382_v11  ;;  %v2095_v22 = vsel %vm166_vm5, %v1095_v13, %v1091_v50  ;;  %v508_v56 = vsel %vm501_vm14, %v504_v16, %v507_v47 }
  0xff   : > { %v509_v40 = vsel %vm498_vm8, nan, %v508_v56  ;;  %v1043_v53 = vrot.slane %v2035_v58, 4  ;;  %vm2278_vm8 = vcmask 1041408   ;;  %vm2280_vm13 = vcmask 1044480  }
 0x100   : > { %v386_v29 = vxor.u32 2147483648, %v385_v15  ;;  %v1057_v17 = vrot.slane %v509_v40, 6  ;;  %vm2279_vm10 = vmmov %vm2278_vm8  ;;  %v1062_v41 = vrot.slane %v2080_v62, 3  ;;  %v1065_v0 = vrot.slane %v509_v40, 3 }
 0x101   : > { %vm2281_vm14 = vmmov %vm2280_vm13  ;;  %v1097_v2 = vsel %vm168_vm12, %v2095_v22, 0.0 }
 0x102   : > { %v387_v14 = vsel %vm304_vm11, %v386_v29, %v385_v15  ;;  %vm811_vm11 = vcmp.lt.s32.totalorder %v810_v34, 2 }
 0x103   : > { %v390_v20 = vsel %vm303_vm9, %v1888_v12, %v387_v14  ;;  %vm394_vm9 = vweird.f32 %v1888_v12 }
 0x104   : > { %1606 = vcosq.f32 %v390_v20 }
 0x105   : > { %1608 = vsinq.f32 %v390_v20 }
 0x10e   : > { %v1607_v21 = vpop.eup %1606 }
 0x10f   : > { %v1609_v38 = vpop.eup %1608  ;;  %v402_v19 = vxor.u32 2147483648, %v1607_v21 }
 0x110   : > { %v399_v39 = vxor.u32 2147483648, %v1609_v38 }
 0x111   : > { %v403_v42 = vsel %vm401_vm15, %v402_v19, %v1609_v38  ;;  %v817_v6 = vsel %vm815_vm7, %v402_v19, %v1609_v38  ;;  %vm2282_vm15 = vmmov %vm2278_vm8 }
 0x112   : > { %v400_v26 = vsel %vm398_vm6, %v1607_v21, %v399_v39  ;;  %v814_v24 = vsel %vm812_vm2, %v1607_v21, %v399_v39  ;;  %v1079_v1 = vsel %vm2282_vm15, %v1065_v0, %v2080_v62  ;;  %vm2283_vm7 = vmmov %vm2280_vm13 }
 0x113   : > { %v404_v44 = vsel %vm397_vm0, %v400_v26, %v403_v42  ;;  %v818_v31 = vsel %vm811_vm11, %v814_v24, %v817_v6  ;;  %v1080_v60 = vsel %vm2283_vm7, %v1079_v1, %v509_v40 }
 0x114   : > { %v405_v43 = vsel %vm394_vm9, nan, %v404_v44  ;;  %v819_v49 = vsel %vm394_vm9, nan, %v818_v31 }
 0x115   : > { %v1038_v3 = vrot.slane %v405_v43, 7  ;;  %v1044_v48 = vrot.slane %v819_v49, 4  ;;  %v1047_v55 = vrot.slane %v405_v43, 4  ;;  %v1049_v51 = vrot.slane %v819_v49, 1 }
 0x116   : > { %v1051_v57 = vrot.slane %v405_v43, 1  ;;  %v1056_v59 = vrot.slane %v405_v43, 6  ;;  %v1053_v12 = vrot.slane %v819_v49, 6  ;;  %v1061_v61 = vrot.slane %v819_v49, 3 }
 0x117   : > { %v1039_v35 = vsel %vm164_vm4, %v1037_v28, %v1038_v3  ;;  %v1045_v36 = vsel %vm166_vm5, %v1043_v53, %v1044_v48 }
 0x118   : > { %v1072_v27 = vsel %vm2278_vm8, %v1039_v35, %v1045_v36  ;;  %v1058_v37 = vsel %vm2279_vm10, %v1056_v59, %v1057_v17  ;;  %v1074_v63 = vsel %vm160_vm1, %v1049_v51, %v1051_v57  ;;  %v1063_v4 = vsel %vm2281_vm14, %v1061_v61, %v1062_v41 }
 0x119   : > { %v1073_v58 = vsel %vm2280_vm13, %v1072_v27, %v1047_v55  ;;  %v1076_v28 = vsel %vm164_vm4, %v1053_v12, %v1058_v37  ;;  %v1075_v46 = vsel %vm162_vm3, %v1074_v63, %v1053_v12  ;;  %vm1130_vm1 = vcmask 515072  }
 0x11a   : > { %1100 = vxpose.xlu0.b32.cont [3/8] (short) %v1073_v58, 128  ;;  %v1077_v52 = vsel %vm166_vm5, %v1076_v28, %v1063_v4 }
 0x11b   : > { %v1078_v54 = vsel %vm168_vm12, %v1077_v52, %v1065_v0 }
 0x11e   : > { %1101 = vxpose.xlu0.b32.cont [4/8] (short) %v1075_v46, 128 }
 0x122   : > { %1102 = vxpose.xlu0.b32.cont [5/8] (short) %v1078_v54, 128 }
 0x126   : > { %1103 = vxpose.xlu0.b32.cont [6/8] (short) %v1080_v60, 128 }
 0x12a   : > { %1104 = vxpose.xlu0.b32.cont [7/8] (short) %v2090_v18, 128 }
 0x12e   : > { %1105 = vxpose.xlu0.b32.end [8/8] (short) %v1097_v2, 128 }
 0x192   : > { %v1114_v7 = vpop.trf.xlu0 }
 0x193   : > { %1131 = vst.msk [vmem:[%s2134_s5] sm:$0xff] %vm1130_vm1, %v1114_v7 }
 0x196   : > { %v1115_v62 = vpop.trf.xlu0 }
 0x197   : > { %1132 = vst.msk [vmem:[%s2134_s5 + $0x8] sm:$0xff] %vm1130_vm1, %v1115_v62 }
 0x19a   : > { %v1116_v8 = vpop.trf.xlu0 }
 0x19b   : > { %1133 = vst.msk [vmem:[%s2134_s5 + $0x10] sm:$0xff] %vm1130_vm1, %v1116_v8 }
 0x19e   : > { %v1117_v50 = vpop.trf.xlu0 }
 0x19f   : > { %1134 = vst.msk [vmem:[%s2134_s5 + $0x18] sm:$0xff] %vm1130_vm1, %v1117_v50 }
 0x1a2   : > { %v1118_v11 = vpop.trf.xlu0 }
 0x1a3   : > { %1135 = vst.msk [vmem:[%s2134_s5 + $0x20] sm:$0xff] %vm1130_vm1, %v1118_v11 }
 0x1a6   : > { %v1119_v9 = vpop.trf.xlu0 }
 0x1a7   : > { %1136 = vst.msk [vmem:[%s2134_s5 + $0x28] sm:$0xff] %vm1130_vm1, %v1119_v9 }
 0x1aa   : > { %v1120_v10 = vpop.trf.xlu0 }
 0x1ab   : > { %1137 = vst.msk [vmem:[%s2134_s5 + $0x30] sm:$0xff] %vm1130_vm1, %v1120_v10 }
 0x1ae   : > { %v1121_v18 = vpop.trf.xlu0 }
 0x1af   : > { %1138 = vst.msk [vmem:[%s2134_s5 + $0x38] sm:$0xff] %vm1130_vm1, %v1121_v18 }
 0x1b2   : > { %v1122_v13 = vpop.trf.xlu0 }
 0x1b3   : > { %1139 = vst.msk [vmem:[%s2134_s5 + $0x40] sm:$0xff] %vm1130_vm1, %v1122_v13 }
 0x1b6   : > { %v1123_v15 = vpop.trf.xlu0 }
 0x1b7   : > { %1140 = vst.msk [vmem:[%s2134_s5 + $0x48] sm:$0xff] %vm1130_vm1, %v1123_v15 }
 0x1ba   : > { %v1124_v25 = vpop.trf.xlu0 }
 0x1bb   : > { %1141 = vst.msk [vmem:[%s2134_s5 + $0x50] sm:$0xff] %vm1130_vm1, %v1124_v25 }
 0x1be   : > { %v1125_v22 = vpop.trf.xlu0 }
 0x1bf   : > { %1142 = vst.msk [vmem:[%s2134_s5 + $0x58] sm:$0xff] %vm1130_vm1, %v1125_v22 }
 0x1c2   : > { %v1126_v29 = vpop.trf.xlu0 }
 0x1c3   : > { %1143 = vst.msk [vmem:[%s2134_s5 + $0x60] sm:$0xff] %vm1130_vm1, %v1126_v29 }
 0x1c6   : > { %v1127_v23 = vpop.trf.xlu0 }
 0x1c7   : > { %1144 = vst.msk [vmem:[%s2134_s5 + $0x68] sm:$0xff] %vm1130_vm1, %v1127_v23 }
 0x1c9   : > { %1153 = sbr.rel (!%p1745_p4) target bundleno = 513 (0x201), region = 32 }
 0x1ca   : > { %v1128_v14 = vpop.trf.xlu0 }
 0x1cb   : > { %1145 = vst.msk [vmem:[%s2134_s5 + $0x70] sm:$0xff] %vm1130_vm1, %v1128_v14 }
 0x1ce   : > { %v1129_v5 = vpop.trf.xlu0 }
 0x1cf   : > { %1146 = vst.msk [vmem:[%s2134_s5 + $0x78] sm:$0xff] %vm1130_vm1, %v1129_v5 }
 0x1d0   : > { %s2291_s8 = smov (!%p1156_p8, %s1155_s8), 16 }
 0x1d1   : > { %s1462_s15 = sshll.u32 %s2291_s8, 7 }
 0x1d2   : > { %p1465_p9 = scmp.eq.s32.totalorder %s1462_s15, 0 }
 0x1d3   : > { %s2181_s17 = sshrl.u32 (!%p1465_p9), %s2291_s8, 4 }
 0x1d4   : > { %1164 = sbr.rel (%p1465_p9) target bundleno = 513 (0x201), region = 36  ;;  %p1466_p10 = scmp.le.s32.totalorder (!%p1465_p9), %s2181_s17, 0 }
 0x1db   : > { %1378 = sbr.rel (%p1466_p10) target bundleno = 492 (0x1ec), region = 112  ;;  %s2284_s12 = smov (!%p1466_p10), %s2175_s14 }
 0x1dc   : > { %s2285_s18 = smov (!%p1466_p10), %s2134_s5  ;;  %s2190_s19 = smov (!%p1466_p10), 0  }
 0x1dd   : > { %s2192_s20 = smov (!%p1466_p10), 0  }
 0x1e2 LB: >> { %v1256_v20 = vld [vmem:[%s1672_s18] sm:$0xff]  ;;  %v1258_v30 = vld [vmem:[%s1672_s18 + $0x8] sm:$0xff]  ;;  %v1260_v45 = vld [vmem:[%s1672_s18 + $0x10] sm:$0xff]  ;;  %s1288_s21 = sadd.s32 1, %s1676_s19  ;;  %s1250_s20 = sadd.s32 1, %s1680_s20   ;;  %s1680_s20 = sphi %s2192_s20, %s1250_s20   ;;  %s1676_s19 = sphi %s2190_s19, %s2286_s19   ;;  %s1672_s18 = sphi %s2285_s18, %s1293_s18   ;;  %s1668_s12 = sphi %s2284_s12, %s1294_s12  }
 0x1e3   : >> { %1257 = vst [vmem:[%s1668_s12] sm:$0xff] %v1256_v20  ;;  %1259 = vst [vmem:[%s1668_s12 + $0x8] sm:$0xff] %v1258_v30  ;;  %v1262_v32 = vld [vmem:[%s1672_s18 + $0x18] sm:$0xff]  ;;  %v1264_v16 = vld [vmem:[%s1672_s18 + $0x20] sm:$0xff]  ;;  %p1289_p11 = scmp.ge.s32.totalorder %s1288_s21, %s2181_s17  ;;  %p1249_p12 = scmp.ge.s32.totalorder %s1250_s20, %s2181_s17 }
 0x1e4   : >> { %1261 = vst [vmem:[%s1668_s12 + $0x10] sm:$0xff] %v1260_v45  ;;  %v1266_v47 = vld [vmem:[%s1672_s18 + $0x28] sm:$0xff]  ;;  %1263 = vst [vmem:[%s1668_s12 + $0x18] sm:$0xff] %v1262_v32  ;;  %v1268_v33 = vld [vmem:[%s1672_s18 + $0x30] sm:$0xff] }
 0x1e5   : >> { %1265 = vst [vmem:[%s1668_s12 + $0x20] sm:$0xff] %v1264_v16  ;;  %1267 = vst [vmem:[%s1668_s12 + $0x28] sm:$0xff] %v1266_v47  ;;  %v1270_v34 = vld [vmem:[%s1672_s18 + $0x38] sm:$0xff]  ;;  %v1272_v56 = vld [vmem:[%s1672_s18 + $0x40] sm:$0xff]  ;;  %s2293_s21 = smov (%p1289_p11, %s1288_s21), 0  ;;  %1252 = sbr.rel (!%p1249_p12) target bundleno = 482 (0x1e2), region = 118 }
 0x1e6   : >> { %1269 = vst [vmem:[%s1668_s12 + $0x30] sm:$0xff] %v1268_v33  ;;  %1271 = vst [vmem:[%s1668_s12 + $0x38] sm:$0xff] %v1270_v34  ;;  %v1274_v21 = vld [vmem:[%s1672_s18 + $0x48] sm:$0xff]  ;;  %v1276_v38 = vld [vmem:[%s1672_s18 + $0x50] sm:$0xff]  ;;  %s1467_s22 = sshll.u32 %s2293_s21, 7  ;;  %s2286_s19 = smov %s2293_s21 }
 0x1e7   : >> { %1273 = vst [vmem:[%s1668_s12 + $0x40] sm:$0xff] %v1272_v56  ;;  %v1278_v19 = vld [vmem:[%s1672_s18 + $0x58] sm:$0xff]  ;;  %1275 = vst [vmem:[%s1668_s12 + $0x48] sm:$0xff] %v1274_v21  ;;  %v1280_v39 = vld [vmem:[%s1672_s18 + $0x60] sm:$0xff] }
 0x1e8   : >> { %1277 = vst [vmem:[%s1668_s12 + $0x50] sm:$0xff] %v1276_v38  ;;  %1279 = vst [vmem:[%s1668_s12 + $0x58] sm:$0xff] %v1278_v19  ;;  %v1282_v40 = vld [vmem:[%s1672_s18 + $0x68] sm:$0xff]  ;;  %v1284_v42 = vld [vmem:[%s1672_s18 + $0x70] sm:$0xff] }
 0x1e9   : >> { %1281 = vst [vmem:[%s1668_s12 + $0x60] sm:$0xff] %v1280_v39  ;;  %1283 = vst [vmem:[%s1668_s12 + $0x68] sm:$0xff] %v1282_v40  ;;  %v1286_v6 = vld [vmem:[%s1672_s18 + $0x78] sm:$0xff]  ;;  %s1293_s18 = scalar_lea.vmem %s2134_s5, %s1467_s22 [#allocation2]  }
 0x1ea   : >> { %1285 = vst [vmem:[%s1668_s12 + $0x70] sm:$0xff] %v1284_v42  ;;  %1287 = vst [vmem:[%s1668_s12 + $0x78] sm:$0xff] %v1286_v6  ;;  %s1294_s12 = scalar_lea.vmem %s2175_s14, %s1467_s22  }
 0x1ec PF: > { %s2250_s23 = sand.u32 15, %s2291_s8   ;;  %s1478_s24 = sshll.u32 %s2181_s17, 7 }
 0x1ed   : > { %s1299_s25 = scalar_lea.vmem %s2134_s5, %s1478_s24 [#allocation2]   ;;  %s1301_s26 = scalar_lea.vmem %s2175_s14, %s1478_s24  }
 0x1ee   : > { %p1472_p13 = scmp.le.s32.totalorder %s2250_s23, 0 }
 0x1ef   : > { %s1682_s27 = smov (!%p1472_p13), %s1301_s26   ;;  %s1686_s28 = smov (!%p1472_p13), %s1299_s25  }
 0x1f0   : > { %1392 = sbr.rel (%p1472_p13) target bundleno = 513 (0x201), region = 123  ;;  %s1690_s29 = smov (!%p1472_p13), 0  }
 0x1f1   : > { %s1694_s30 = smov (!%p1472_p13), 0  }
 0x1f7 LB: >> { %v1311_v26 = vld [vmem:[%s1688_s28] sm:$0xff]  ;;  %s1313_s3 = sadd.s32 1, %s1692_s29  ;;  %s1305_s30 = sadd.s32 1, %s1696_s30   ;;  %s1696_s30 = sphi %s1694_s30, %s1305_s30   ;;  %s1692_s29 = sphi %s1690_s29, %s1691_s29   ;;  %s1688_s28 = sphi %s1686_s28, %s1318_s28   ;;  %s1684_s27 = sphi %s1682_s27, %s1319_s27  }
 0x1f8   : >> { %1312 = vst [vmem:[%s1684_s27] sm:$0xff] %v1311_v26  ;;  %p1314_p0 = scmp.ge.s32.totalorder %s1313_s3, %s2250_s23  ;;  %p1304_p1 = scmp.ge.s32.totalorder %s1305_s30, %s2250_s23 }
 0x1fa   : >> { %s2295_s3 = smov (%p1314_p0, %s1313_s3), 0  ;;  %1307 = sbr.rel (!%p1304_p1) target bundleno = 503 (0x1f7), region = 129 }
 0x1fb   : >> { %s1473_s4 = sshll.u32 %s2295_s3, 3  ;;  %s1691_s29 = smov %s2295_s3  }
 0x1fc   : >> { %s1318_s28 = scalar_lea.vmem %s1299_s25, %s1473_s4 [#allocation2]   ;;  %s1319_s27 = scalar_lea.vmem %s1301_s26, %s1473_s4  }
 0x201 PF: > { %p9_p2 = scmp.ge.s32.totalorder %s1735_s13, 5   ;;  %s2287_s9 = smov %s1660_s10 }
 0x202   : > { %s2288_s10 = smov %s1743_s16  ;;  %s2289_s11 = smov %s1735_s13 }
 0x203   :  { %11 = sbr.rel (!%p9_p2) target bundleno = 2 (0x2), region = 140 }

// kernel: _embed_lanedense.1
= control target key start
LH: loop header
LB: loop body
LE: loop exit
PB: predicated region body
PF: predicated region fallthrough
CT: control target
= control target key end

     0   :  { %s1373_s9 = smov 0   ;;  %s1375_s10 = smov 0   ;;  %s1856_s0 = inlined_call_operand.vmem [shape: f32[30,1], index: 0, kind: input, shape index: {}]   ;;  %s1857_s1 = inlined_call_operand.vmem [shape: f32[3,1024], index: 1, kind: input, shape index: {}]   ;;  %s1858_s2 = inlined_call_operand.vmem [shape: f32[63,1024], index: 2, kind: output, shape index: {}]  }
   0x1   :  { %s1377_s11 = smov 0  }
   0x2 LB: > { %s1386_s12 = sadd.s32 4294967295, %s1349_s11   ;;  %s1388_s13 = sadd.s32 1, %s1349_s11   ;;  %s1349_s11 = sphi %s1377_s11, %s1874_s11   ;;  %s1345_s10 = sphi %s1375_s10, %s1873_s10   ;;  %s1341_s9 = sphi %s1373_s9, %s1872_s9  }
   0x3   : > { %s63_s14 = ssub.s32 %s1349_s11, %s1388_s13  ;;  %s66_s15 = sadd.s32 1, %s1345_s10 }
   0x4   : > { %p64_p0 = scmp.eq.s32.totalorder %s63_s14, 0  ;;  %p76_p1 = scmp.ne.s32.totalorder %s1345_s10, %s1341_s9 }
   0x5   : > { %p77_p2 = scmp.eq.s32.totalorder %s1386_s12, 7  ;;  %p1223_p3 = scmp.ge.s32.totalorder %s1349_s11, 1 }
   0x6   : > { %s1396_s16 = scalar_select %p64_p0, %s1345_s10, %s66_s15  }
   0x7   : > { %p1398_p4 = por %p77_p2, %p76_p1  ;;  %p111_p5 = scmp.lt.s32.totalorder %s1349_s11, 9 }
   0x9   : > { %p112_p6 = pnand %p1223_p3, %p111_p5 }
   0xa   : > { %v137_v0 = vld [vmem:[%s1856_s0 + $0x8] sm:$0xff] (!%p112_p6)  ;;  %v136_v1 = vld [vmem:[%s1856_s0] sm:$0xff] (!%p112_p6)  ;;  %v1351_v2 = vmov (!%p112_p6), 0   ;;  %v138_v3 = vld [vmem:[%s1856_s0 + $0x10] sm:$0xff] (!%p112_p6)  ;;  %p131_p7 = scmp.lt.s32.totalorder (!%p112_p6), %s1386_s12, 7  ;;  %vm159_vm0 = vcmask (!%p112_p6), 1040384  }
   0xb   : > { %115 = sbr.rel (%p112_p6) target bundleno = 306 (0x132), region = 28  ;;  %1310 = vset.pattern.permute.xlu1 (!%p112_p6), %v1351_v2  ;;  %1309 = vset.pattern.permute.xlu0 (!%p112_p6), %v1351_v2  ;;  %v139_v4 = vld [vmem:[%s1856_s0 + $0x18] sm:$0x3f] (!%p112_p6)  ;;  %vm161_vm1 = vcmask (!%p112_p6), 1043456   ;;  %vm155_vm2 = vcmask (!%p112_p6), 1042432   ;;  %vm163_vm3 = vcmask (!%p112_p6), 1046528  }
   0xc   : > { %176 = vperm.xlu0 (!%p112_p6), %1309, %v137_v0   ;;  %171 = vperm.xlu1 (!%p112_p6), %1310, %v136_v1   ;;  %vm157_vm4 = vcmask (!%p112_p6), 1045504   ;;  %vm1860_vm5 = vcmask (!%p112_p6), 1041408   ;;  %vm1859_vm6 = vcmask (!%p112_p6), 1044480   ;;  %v1352_v54 = vmov (!%p112_p6), 683565275   ;;  %s128_s3 = sand.u32 (!%p112_p6), 1, %s1341_s9  }
   0xd   : > { %v1353_v58 = vmov (!%p112_p6), 2475754826   ;;  %v1354_v60 = vmov (!%p112_p6), 2131351028   ;;  %v1355_v62 = vmov (!%p112_p6), 2102212464  }
   0xe   : > { %v1356_v0 = vmov (!%p112_p6), 920167782   ;;  %s1224_s4 = sshll.u32 (!%p112_p6), %s128_s3, 6 }
   0xf   : > { %s1740_s5 = scalar_lea.vmem (!%p112_p6), [#allocation2], %s1224_s4 }
  0x10   : > { %181 = vperm.xlu0 (!%p112_p6), %1309, %v138_v3   ;;  %186 = vperm.xlu1 (!%p112_p6), %1310, %v139_v4  }
  0x12   : > { %s132_s26 = scalar_select %p131_p7, %s1386_s12, 7 }
  0x13   : > { %s1259_s6 = sshll.u32 (%p1398_p4), %s1386_s12, 3 }
  0x14   : > { %s1225_s27 = sshll.u32 %s132_s26, 2  ;;  %s1108_s9 = scalar_lea.vmem (%p1398_p4), %s1858_s2, %s1259_s6 }
  0x15   : > { %s134_s30 = scalar_lea.vmem %s1857_s1, %s1225_s27 }
  0x16   : > { %v1419_v5 = vld [vmem:[%s134_s30] sm:$0x7] }
  0x17   : > { %v143_v6 = vrot.slane %v1419_v5, 2  ;;  %v145_v7 = vrot.slane %v1419_v5, 7  ;;  %v147_v8 = vrot.slane %v1419_v5, 4  ;;  %v141_v9 = vrot.slane %v1419_v5, 5 }
  0x18   : > { %v149_v11 = vrot.slane %v1419_v5, 1  ;;  %v151_v14 = vrot.slane %v1419_v5, 6  ;;  %v153_v17 = vrot.slane %v1419_v5, 3 }
  0x19   : > { %v160_v10 = vsel %vm159_vm0, %v143_v6, %v145_v7  ;;  %v156_v13 = vsel %vm155_vm2, %v1419_v5, %v141_v9 }
  0x1a   : > { %v162_v12 = vsel %vm161_vm1, %v160_v10, %v147_v8  ;;  %v158_v16 = vsel %vm157_vm4, %v156_v13, %v143_v6  ;;  %v166_v18 = vsel %vm1860_vm5, %v149_v11, %v151_v14  ;;  %v1357_v8 = vmov 1326507024  }
  0x1b   : > { %v164_v15 = vsel %vm163_vm3, %v162_v12, %v149_v11  ;;  %v168_v23 = vsel %vm1859_vm6, %v166_v18, %v153_v17 }
  0x8b   : > { %v177_v19 = vpop.permute.xlu0 %176  ;;  %v172_v20 = vpop.permute.xlu1 %171 }
  0x8c   : > { %v1435_v21 = vmul.f32 %v177_v19, %v164_v15  ;;  %v1437_v22 = vmul.f32 %v172_v20, %v158_v16 }
  0x8e   : > { %v297_v24 = vand.u32 2147483647, %v1435_v21  ;;  %v300_v25 = vand.u32 2139095040, %v1435_v21  ;;  %v193_v26 = vand.u32 2147483647, %v1437_v22  ;;  %v196_v27 = vand.u32 2139095040, %v1437_v22 }
  0x8f   : > { %v182_v28 = vpop.permute.xlu0 %181  ;;  %v187_v42 = vpop.permute.xlu1 %186 }
  0x90   : > { %v301_v29 = vshrl.u32 %v300_v25, 23  ;;  %v1444_v30 = vmul.f32 %v182_v28, %v168_v23  ;;  %v304_v31 = vand.u32 8388607, %v297_v24  ;;  %v197_v32 = vshrl.u32 %v196_v27, 23 }
  0x91   : > { %v200_v33 = vand.u32 8388607, %v193_v26  ;;  %v1451_v48 = vmul.f32 %v187_v42, %v156_v13 }
  0x92   : > { %v1230_v34 = vadd.s32 4294967169, %v301_v29  ;;  %v1226_v35 = vadd.s32 4294967169, %v197_v32  ;;  %v404_v36 = vand.u32 2139095040, %v1444_v30  ;;  %v305_v38 = vor.u32 8388608, %v304_v31 }
  0x93   : > { %v201_v39 = vor.u32 8388608, %v200_v33  ;;  %v401_v52 = vand.u32 2147483647, %v1444_v30 }
  0x94   : > { %v307_v37 = vadd.s32 1, %v1230_v34  ;;  %v203_v40 = vadd.s32 1, %v1226_v35  ;;  %v405_v41 = vshrl.u32 %v404_v36, 23  ;;  %v1453_v49 = vshll.u32 %v305_v38, 8 }
  0x95   : > { %v1457_v51 = vshll.u32 %v201_v39, 8 }
  0x96   : > { %vm308_vm7 = vcmp.gt.s32.totalorder %v307_v37, 0  ;;  %vm204_vm8 = vcmp.gt.s32.totalorder %v203_v40, 0  ;;  %v1234_v44 = vadd.s32 4294967169, %v405_v41 }
  0x97   : > { %v309_v43 = vsel %vm308_vm7, %v307_v37, 0  ;;  %v205_v47 = vsel %vm204_vm8, %v203_v40, 0 }
  0x98   : > { %v310_v45 = vshrl.u32 %v309_v43, 5  ;;  %v311_v46 = vand.u32 31, %v309_v43  ;;  %v1455_v50 = vshrl.u32 %v205_v47, 5  ;;  %v207_v56 = vand.u32 31, %v205_v47 }
  0x99   : > { %v1461_v57 = vadd.s32 1, %v1234_v44 }
  0x9a   : > { %v312_v53 = vsub.s32 32, %v311_v46  ;;  %v314_v55 = vshll.u32 %v1352_v54, %v311_v46  ;;  %v317_v59 = vshll.u32 %v1353_v58, %v311_v46  ;;  %v320_v61 = vshll.u32 %v1354_v60, %v311_v46 }
  0x9b   : > { %v323_v63 = vshll.u32 %v1355_v62, %v311_v46  ;;  %v326_v1 = vshll.u32 %v1356_v0, %v311_v46  ;;  %vm329_vm9 = vcmp.lt.s32.totalorder %v310_v45, 1  ;;  %vm331_vm10 = vcmp.lt.s32.totalorder %v310_v45, 3 }
  0x9c   : > { %v315_v2 = vshrl.u32 %v1353_v58, %v312_v53  ;;  %v318_v3 = vshrl.u32 %v1354_v60, %v312_v53  ;;  %v321_v4 = vshrl.u32 %v1355_v62, %v312_v53  ;;  %v313_v6 = vshrl.u32 %v1352_v54, %v312_v53 }
  0x9d   : > { %v324_v7 = vshrl.u32 %v1356_v0, %v312_v53  ;;  %v327_v9 = vshrl.u32 %v1357_v8, %v312_v53  ;;  %v208_v13 = vsub.s32 32, %v207_v56  ;;  %vm332_vm11 = vcmp.lt.s32.totalorder %v310_v45, 4 }
  0x9e   : > { %v316_v10 = vor.u32 %v315_v2, %v314_v55  ;;  %v319_v11 = vor.u32 %v318_v3, %v317_v59  ;;  %v322_v12 = vor.u32 %v321_v4, %v320_v61  ;;  %v210_v16 = vshll.u32 %v1352_v54, %v207_v56 }
  0x9f   : > { %v325_v14 = vor.u32 %v324_v7, %v323_v63  ;;  %v328_v15 = vor.u32 %v327_v9, %v326_v1  ;;  %v213_v28 = vshll.u32 %v1353_v58, %v207_v56  ;;  %vm330_vm12 = vcmp.lt.s32.totalorder %v310_v45, 2 }
  0xa0   : > { %v333_v17 = vsel %vm329_vm9, %v313_v6, %v316_v10  ;;  %v334_v18 = vsel %vm332_vm11, %v322_v12, 2102212464  ;;  %v337_v19 = vsel %vm329_vm9, %v316_v10, %v319_v11  ;;  %v341_v20 = vsel %vm329_vm9, %v319_v11, %v322_v12 }
  0xa1   : > { %v335_v23 = vsel %vm331_vm10, %v319_v11, %v334_v18  ;;  %v338_v25 = vsel %vm332_vm11, %v325_v14, 920167782  ;;  %v342_v27 = vsel %vm332_vm11, %v328_v15, 1326507024  ;;  %v211_v32 = vshrl.u32 %v1353_v58, %v208_v13 }
  0xa2   : > { %v339_v29 = vsel %vm331_vm10, %v322_v12, %v338_v25  ;;  %v343_v31 = vsel %vm331_vm10, %v325_v14, %v342_v27  ;;  %v336_v33 = vsel %vm330_vm12, %v333_v17, %v335_v23  ;;  %v214_v36 = vshrl.u32 %v1354_v60, %v208_v13 }
  0xa3   : > { %v340_v34 = vsel %vm330_vm12, %v337_v19, %v339_v29  ;;  %v344_v35 = vsel %vm330_vm12, %v341_v20, %v343_v31  ;;  %v212_v41 = vor.u32 %v211_v32, %v210_v16  ;;  %v216_v43 = vshll.u32 %v1354_v60, %v207_v56 }
  0xa4   : > { %v1484_v37 = vmul.u32.u64.low %v1453_v49, %v344_v35  ;;  %v1485_v38 = vmul.u32.u64.high %v1453_v49, %v344_v35, %v1484_v37  ;;  %v1488_v39 = vmul.u32.u64.low %v1453_v49, %v340_v34  ;;  %v1489_v40 = vmul.u32.u64.high %v1453_v49, %v340_v34, %v1488_v39 }
  0xa5   : > { %v215_v42 = vor.u32 %v214_v36, %v213_v28  ;;  %v217_v44 = vshrl.u32 %v1355_v62, %v208_v13  ;;  %v219_v45 = vshll.u32 %v1355_v62, %v207_v56  ;;  %v220_v46 = vshrl.u32 %v1356_v0, %v208_v13 }
  0xa6   : > { %v222_v47 = vshll.u32 %v1356_v0, %v207_v56  ;;  %v223_v53 = vshrl.u32 %v1357_v8, %v208_v13  ;;  %v352_v55 = vmul.u32 %v1453_v49, %v336_v33  ;;  %v209_v59 = vshrl.u32 %v1352_v54, %v208_v13 }
  0xa7   : > { %v218_v61 = vor.u32 %v217_v44, %v216_v43  ;;  %vm225_vm13 = vcmp.lt.s32.totalorder %v1455_v50, 1  ;;  %vm354_vm14 = vc.u32 %v1485_v38, %v1488_v39  ;;  %v355_v63 = vadd.s32 1, %v1489_v40 }
  0xa8   : > { %v221_v1 = vor.u32 %v220_v46, %v219_v45  ;;  %vm226_vm15 = vcmp.lt.s32.totalorder %v1455_v50, 2  ;;  %v224_v2 = vor.u32 %v223_v53, %v222_v47  ;;  %vm227_vm7 = vcmp.lt.s32.totalorder %v1455_v50, 3 }
  0xa9   : > { %vm228_vm8 = vcmp.lt.s32.totalorder %v1455_v50, 4  ;;  %v233_v56 = vsel %vm225_vm13, %v212_v41, %v215_v42  ;;  %v356_v49 = vsel %vm354_vm14, %v355_v63, %v1489_v40  ;;  %v237_v6 = vsel %vm225_vm13, %v215_v42, %v218_v61 }
  0xaa   : > { %v230_v3 = vsel %vm228_vm8, %v218_v61, 2102212464  ;;  %v234_v4 = vsel %vm228_vm8, %v221_v1, 920167782  ;;  %v357_v7 = vadd.s32 %v356_v49, %v352_v55  ;;  %v229_v9 = vsel %vm225_vm13, %v209_v59, %v212_v41 }
  0xab   : > { %v235_v10 = vsel %vm227_vm7, %v218_v61, %v234_v4  ;;  %v238_v11 = vsel %vm228_vm8, %v224_v2, 1326507024  ;;  %v231_v12 = vsel %vm227_vm7, %v215_v42, %v230_v3  ;;  %vm412_vm9 = vcmp.gt.s32.totalorder %v1461_v57, 0 }
  0xac   : > { %v236_v13 = vsel %vm226_vm15, %v233_v56, %v235_v10  ;;  %v239_v14 = vsel %vm227_vm7, %v221_v1, %v238_v11  ;;  %v358_v15 = vadd.s32 536870912, %v357_v7  ;;  %v232_v25 = vsel %vm226_vm15, %v229_v9, %v231_v12 }
  0xad   : > { %v240_v16 = vsel %vm226_vm15, %v237_v6, %v239_v14  ;;  %v1514_v17 = vmul.u32.u64.low %v1457_v51, %v236_v13  ;;  %v1515_v18 = vmul.u32.u64.high %v1457_v51, %v236_v13, %v1514_v17  ;;  %v408_v27 = vand.u32 8388607, %v401_v52 }
  0xae   : > { %v1518_v19 = vmul.u32.u64.low %v1457_v51, %v240_v16  ;;  %v1519_v20 = vmul.u32.u64.high %v1457_v51, %v240_v16, %v1518_v19  ;;  %v359_v23 = vshrl.u32 %v358_v15, 30  ;;  %v413_v28 = vsel %vm412_vm9, %v1461_v57, 0 }
  0xaf   : > { %v251_v31 = vadd.s32 1, %v1515_v18  ;;  %v508_v32 = vand.u32 2139095040, %v1451_v48  ;;  %v248_v33 = vmul.u32 %v1457_v51, %v232_v25  ;;  %v415_v50 = vand.u32 31, %v413_v28 }
  0xb0   : > { %v360_v29 = vshll.u32 %v359_v23, 30  ;;  %vm250_vm10 = vc.u32 %v1519_v20, %v1514_v17  ;;  %v383_v35 = vsub.s32 4, %v359_v23  ;;  %v409_v40 = vor.u32 8388608, %v408_v27 }
  0xb1   : > { %v252_v36 = vsel %vm250_vm10, %v251_v31, %v1515_v18  ;;  %v505_v42 = vand.u32 2147483647, %v1451_v48  ;;  %v509_v57 = vshrl.u32 %v508_v32, 23  ;;  %vm299_vm11 = vcmp.lt.s32.totalorder %v1435_v21, 0 }
  0xb2   : > { %v361_v34 = vsub.s32 %v357_v7, %v360_v29  ;;  %v253_v37 = vadd.s32 %v252_v36, %v248_v33  ;;  %v384_v51 = vsel %vm299_vm11, %v383_v35, %v359_v23  ;;  %v416_v45 = vsub.s32 32, %v415_v50 }
  0xb3   : > { %vm1537_vm12 = vcmp.le.f32.partialorder %v297_v24, 0.7853982  ;;  %v353_v47 = vadd.s32 %v1488_v39, %v1485_v38  ;;  %v1543_v55 = vshll.u32 %v409_v40, 8  ;;  %vm195_vm13 = vcmp.lt.s32.totalorder %v1437_v22, 0 }
  0xb4   : > { %v363_v41 = vsub.s32 0, %v361_v34  ;;  %v254_v43 = vadd.s32 536870912, %v253_v37  ;;  %v1546_v61 = vshrl.u32 %v413_v28, 5  ;;  %v1548_v63 = vadd.s32 4294967169, %v509_v57 }
  0xb5   : > { %v1552_v1 = vand.u32 8388607, %v505_v42  ;;  %v1556_v24 = vsel %vm1537_vm12, 0, %v384_v51  ;;  %v1559_v38 = vadd.s32 %v1514_v17, %v1519_v20  ;;  %v418_v2 = vshll.u32 %v1352_v54, %v415_v50 }
  0xb6   : > { %v1231_v44 = vmin.u32 %v363_v41, %v361_v34  ;;  %v255_v53 = vshrl.u32 %v254_v43, 30  ;;  %v417_v49 = vshrl.u32 %v1352_v54, %v416_v45  ;;  %v419_v3 = vshrl.u32 %v1353_v58, %v416_v45 }
  0xb7   : > { %v421_v4 = vshll.u32 %v1353_v58, %v415_v50  ;;  %v422_v7 = vshrl.u32 %v1354_v60, %v416_v45  ;;  %v425_v9 = vshrl.u32 %v1355_v62, %v416_v45  ;;  %v428_v10 = vshrl.u32 %v1356_v0, %v416_v45 }
  0xb8   : > { %v365_v59 = vclz %v1231_v44  ;;  %v256_v39 = vshll.u32 %v255_v53, 30  ;;  %v1571_v11 = vadd.s32 3, %v1556_v24  ;;  %v424_v12 = vshll.u32 %v1354_v60, %v415_v50 }
  0xb9   : > { %v431_v13 = vshrl.u32 %v1357_v8, %v416_v45  ;;  %v279_v16 = vsub.s32 4, %v255_v53  ;;  %v427_v17 = vshll.u32 %v1355_v62, %v415_v50  ;;  %v420_v20 = vor.u32 %v419_v3, %v418_v2 }
  0xba   : > { %v1232_v56 = vadd.s32 4294967294, %v365_v59  ;;  %v1565_v6 = vsub.s32 %v253_v37, %v256_v39  ;;  %v430_v23 = vshll.u32 %v1356_v0, %v415_v50  ;;  %v423_v27 = vor.u32 %v422_v7, %v421_v4 }
  0xbb   : > { %v426_v28 = vor.u32 %v425_v9, %v424_v12  ;;  %v429_v29 = vor.u32 %v428_v10, %v427_v17  ;;  %vm1581_vm15 = vcmp.le.f32.partialorder %v193_v26, 0.7853982  ;;  %v280_v40 = vsel %vm195_vm13, %v279_v16, %v255_v53 }
  0xbc   : > { %vm1233_vm14 = vcmp.lt.s32.totalorder %v1232_v56, 0  ;;  %v259_v15 = vsub.s32 0, %v1565_v6  ;;  %v432_v35 = vor.u32 %v431_v13, %v430_v23  ;;  %vm433_vm7 = vcmp.lt.s32.totalorder %v1546_v61, 1 }
  0xbd   : > { %v368_v14 = vsel %vm1233_vm14, 0, %v1232_v56  ;;  %vm434_vm8 = vcmp.lt.s32.totalorder %v1546_v61, 2  ;;  %vm435_vm9 = vcmp.lt.s32.totalorder %v1546_v61, 3  ;;  %vm436_vm10 = vcmp.lt.s32.totalorder %v1546_v61, 4 }
  0xbe   : > { %v369_v18 = vsub.s32 32, %v368_v14  ;;  %v373_v19 = vsub.s32 4294967266, %v368_v14  ;;  %v1227_v25 = vmin.u32 %v259_v15, %v1565_v6  ;;  %v370_v31 = vshll.u32 %v361_v34, %v368_v14 }
  0xbf   : > { %v441_v26 = vsel %vm433_vm7, %v420_v20, %v423_v27  ;;  %v442_v57 = vsel %vm436_vm10, %v429_v29, 920167782  ;;  %v445_v43 = vsel %vm433_vm7, %v423_v27, %v426_v28  ;;  %v438_v51 = vsel %vm436_vm10, %v426_v28, 2102212464 }
  0xc0   : > { %v371_v32 = vshrl.u32 %v353_v47, %v369_v18  ;;  %v374_v33 = vadd.s32 127, %v373_v19  ;;  %v261_v37 = vclz %v1227_v25  ;;  %v443_v45 = vsel %vm435_vm9, %v426_v28, %v442_v57 }
  0xc1   : > { %v446_v47 = vsel %vm436_vm10, %v432_v35, 1326507024  ;;  %v437_v59 = vsel %vm433_vm7, %v417_v49, %v420_v20  ;;  %v444_v3 = vsel %vm434_vm8, %v441_v26, %v443_v45  ;;  %v439_v10 = vsel %vm435_vm9, %v423_v27, %v438_v51 }
  0xc2   : > { %v372_v50 = vor.u32 %v371_v32, %v370_v31  ;;  %v375_v41 = vshll.u32 %v374_v33, 23  ;;  %v1228_v34 = vadd.s32 4294967294, %v261_v37  ;;  %v447_v39 = vsel %vm435_vm9, %v429_v29, %v446_v47 }
  0xc3   : > { %v448_v4 = vsel %vm434_vm8, %v445_v43, %v447_v39  ;;  %v515_v12 = vadd.s32 1, %v1548_v63  ;;  %v1615_v18 = vmul.u32.u64.low %v1543_v55, %v444_v3  ;;  %v1616_v19 = vmul.u32.u64.high %v1543_v55, %v444_v3, %v1615_v18 }
  0xc4   : > { %v376_v44 = vor.u32 4788187, %v375_v41  ;;  %v379_v53 = vcvt.s32.f32 %v372_v50  ;;  %vm1229_vm14 = vcmp.lt.s32.totalorder %v1228_v34, 0  ;;  %v1620_v23 = vand.u32 3, %v1556_v24 }
  0xc5   : > { %v264_v56 = vsel %vm1229_vm14, 0, %v1228_v34  ;;  %v1610_v14 = vmul.u32.u64.low %v1543_v55, %v448_v4  ;;  %v1611_v15 = vmul.u32.u64.high %v1543_v55, %v448_v4, %v1610_v14  ;;  %v1624_v63 = vsel %vm1581_vm15, 0, %v280_v40 }
  0xc6   : > { %v377_v2 = vand.u32 2147483647, %v376_v44  ;;  %v265_v7 = vsub.s32 32, %v264_v56  ;;  %v269_v9 = vsub.s32 4294967266, %v264_v56  ;;  %v266_v49 = vshll.u32 %v1565_v6, %v264_v56 }
  0xc7   : > { %vm516_vm7 = vcmp.gt.s32.totalorder %v515_v12, 0  ;;  %v1631_v29 = vand.u32 3, %v1571_v11  ;;  %vm458_vm9 = vc.u32 %v1611_v15, %v1615_v18  ;;  %v1641_v61 = vadd.s32 3, %v1624_v63 }
  0xc8   : > { %v380_v13 = vmul.f32 %v379_v53, %v377_v2  ;;  %v267_v16 = vshrl.u32 %v1559_v38, %v265_v7  ;;  %v270_v17 = vadd.s32 127, %v269_v9  ;;  %v440_v38 = vsel %vm434_vm8, %v437_v59, %v439_v10 }
  0xc9   : > { %v517_v27 = vsel %vm516_vm7, %v515_v12, 0  ;;  %v459_v33 = vadd.s32 1, %v1616_v19  ;;  %v456_v11 = vmul.u32 %v1543_v55, %v440_v38  ;;  %vm810_vm8 = vcmp.eq.s32.totalorder %v1620_v23, 2 }
  0xca   : > { %v381_v20 = vxor.u32 2147483648, %v380_v13  ;;  %v268_v6 = vor.u32 %v267_v16, %v266_v49  ;;  %v271_v25 = vshll.u32 %v270_v17, 23  ;;  %v1635_v24 = vshrl.u32 %v517_v27, 5 }
  0xcb   : > { %v519_v37 = vand.u32 31, %v517_v27  ;;  %v460_v50 = vsel %vm458_vm9, %v459_v33, %v1616_v19  ;;  %vm807_vm10 = vcmp.eq.s32.totalorder %v1620_v23, 0  ;;  %vm392_vm14 = vcmp.lt.s32.totalorder %v1631_v29, 2 }
  0xcc   : > { %v382_v28 = vsel %vm299_vm11, %v381_v20, %v380_v13  ;;  %v272_v32 = vor.u32 4788187, %v271_v25  ;;  %v275_v35 = vcvt.s32.f32 %v268_v6  ;;  %vm537_vm11 = vcmp.lt.s32.totalorder %v1635_v24, 1 }
  0xcd   : > { %v385_v31 = vsel %vm1537_vm12, %v1435_v21, %v382_v28  ;;  %v461_v41 = vadd.s32 %v460_v50, %v456_v11  ;;  %v520_v46 = vsub.s32 32, %v519_v37  ;;  %v522_v34 = vshll.u32 %v1352_v54, %v519_v37 }
  0xce   : > { %1311 = vcosq.f32 %v385_v31  ;;  %v273_v40 = vand.u32 2147483647, %v272_v32  ;;  %vm539_vm12 = vcmp.lt.s32.totalorder %v1635_v24, 3  ;;  %v525_v57 = vshll.u32 %v1353_v58, %v519_v37 }
  0xcf   : > { %1313 = vsinq.f32 %v385_v31  ;;  %v528_v43 = vshll.u32 %v1354_v60, %v519_v37  ;;  %v531_v55 = vshll.u32 %v1355_v62, %v519_v37  ;;  %v462_v44 = vadd.s32 536870912, %v461_v41 }
  0xd0   : > { %v276_v26 = vmul.f32 %v275_v35, %v273_v40  ;;  %v523_v51 = vshrl.u32 %v1353_v58, %v520_v46  ;;  %v526_v45 = vshrl.u32 %v1354_v60, %v520_v46  ;;  %v1656_v47 = vshll.u32 %v1356_v0, %v519_v37 }
  0xd1   : > { %v529_v59 = vshrl.u32 %v1355_v62, %v520_v46  ;;  %v532_v39 = vshrl.u32 %v1356_v0, %v520_v46  ;;  %v1662_v2 = vshrl.u32 %v1357_v8, %v520_v46  ;;  %vm806_vm7 = vcmp.lt.s32.totalorder %v1620_v23, 2 }
  0xd2   : > { %v277_v53 = vxor.u32 2147483648, %v276_v26  ;;  %v1666_v58 = vshrl.u32 %v462_v44, 30  ;;  %v521_v60 = vshrl.u32 %v1352_v54, %v520_v46  ;;  %v524_v56 = vor.u32 %v523_v51, %v522_v34 }
  0xd3   : > { %v527_v3 = vor.u32 %v526_v45, %v525_v57  ;;  %v530_v7 = vor.u32 %v529_v59, %v528_v43  ;;  %v1671_v62 = vor.u32 %v532_v39, %v531_v55  ;;  %v536_v0 = vor.u32 %v1662_v2, %v1656_v47 }
  0xd4   : > { %v278_v4 = vsel %vm195_vm13, %v277_v53, %v276_v26  ;;  %v464_v9 = vshll.u32 %v1666_v58, 30  ;;  %vm540_vm9 = vcmp.lt.s32.totalorder %v1635_v24, 4  ;;  %v541_v54 = vsel %vm537_vm11, %v521_v60, %v524_v56 }
  0xd5   : > { %v281_v8 = vsel %vm1581_vm15, %v1437_v22, %v278_v4  ;;  %v542_v10 = vsel %vm540_vm9, %v530_v7, 2102212464  ;;  %v545_v12 = vsel %vm537_vm11, %v524_v56, %v527_v3  ;;  %v546_v36 = vsel %vm540_vm9, %v1671_v62, 920167782 }
  0xd6   : > { %1315 = vcosq.f32 %v281_v8  ;;  %v1689_v49 = vsub.s32 %v461_v41, %v464_v9  ;;  %vm538_vm13 = vcmp.lt.s32.totalorder %v1635_v24, 2  ;;  %v543_v14 = vsel %vm539_vm12, %v527_v3, %v542_v10 }
  0xd7   : > { %1317 = vsinq.f32 %v281_v8  ;;  %vm393_vm15 = vcmp.eq.s32.totalorder %v1631_v29, 0  ;;  %v1697_v19 = vsel %vm538_vm13, %v541_v54, %v543_v14  ;;  %v547_v20 = vsel %vm539_vm12, %v530_v7, %v546_v36 }
  0xd8   : > { %v1312_v13 = vpop.eup %1311  ;;  %vm396_vm6 = vcmp.eq.s32.totalorder %v1631_v29, 2  ;;  %v702_v25 = vand.u32 3, %v1624_v63  ;;  %v467_v38 = vsub.s32 0, %v1689_v49  ;;  %v1709_v31 = vsel %vm538_vm13, %v545_v12, %v547_v20 }
  0xd9   : > { %v1314_v16 = vpop.eup %1313  ;;  %v397_v17 = vxor.u32 2147483648, %v1312_v13  ;;  %v549_v32 = vsel %vm537_vm11, %v527_v3, %v530_v7  ;;  %v287_v11 = vand.u32 3, %v1641_v61  ;;  %v513_v50 = vor.u32 8388608, %v1552_v1 }
  0xda   : > { %v394_v6 = vxor.u32 2147483648, %v1314_v16  ;;  %v1235_v63 = vmin.u32 %v467_v38, %v1689_v49  ;;  %vm285_vm11 = vweird.f32 %v1437_v22  ;;  %v457_v51 = vadd.s32 %v1615_v18, %v1611_v15 }
  0xdb   : > { %v398_v27 = vsel %vm396_vm6, %v397_v17, %v1314_v16  ;;  %v812_v28 = vsel %vm810_vm8, %v397_v17, %v1314_v16  ;;  %vm389_vm6 = vweird.f32 %v1435_v21  ;;  %vm703_vm8 = vcmp.lt.s32.totalorder %v702_v25, 2 }
  0xdc   : > { %v395_v33 = vsel %vm393_vm15, %v1312_v13, %v394_v6  ;;  %v809_v35 = vsel %vm807_vm10, %v1312_v13, %v394_v6  ;;  %v469_v61 = vclz %v1235_v63  ;;  %vm704_vm10 = vcmp.eq.s32.totalorder %v702_v25, 0 }
  0xdd   : > { %v399_v37 = vsel %vm392_vm14, %v395_v33, %v398_v27  ;;  %v813_v40 = vsel %vm806_vm7, %v809_v35, %v812_v28  ;;  %vm288_vm14 = vcmp.lt.s32.totalorder %v287_v11, 2  ;;  %vm707_vm15 = vcmp.eq.s32.totalorder %v702_v25, 2 }
  0xde   : > { %v1723_v41 = vsel %vm389_vm6, nan, %v399_v37  ;;  %v1725_v46 = vsel %vm389_vm6, nan, %v813_v40  ;;  %v1236_v34 = vadd.s32 4294967294, %v469_v61  ;;  %vm289_vm7 = vcmp.eq.s32.totalorder %v287_v11, 0 }
  0xdf   : > { %v1044_v21 = vrot.slane %v1725_v46, 1  ;;  %v1046_v29 = vrot.slane %v1723_v41, 1  ;;  %v1048_v23 = vrot.slane %v1725_v46, 6  ;;  %vm292_vm5 = vcmp.eq.s32.totalorder %v287_v11, 2 }
  0xe0   : > { %v1316_v26 = vpop.eup %1315  ;;  %v1732_v57 = vshll.u32 %v513_v50, 8  ;;  %vm1237_vm6 = vcmp.lt.s32.totalorder %v1236_v34, 0  ;;  %v1033_v45 = vrot.slane %v1723_v41, 7  ;;  %v550_v39 = vsel %vm540_vm9, %v536_v0, 1326507024 }
  0xe1   : > { %v1069_v1 = vsel %vm155_vm2, %v1044_v21, %v1046_v29  ;;  %v1318_v43 = vpop.eup %1317  ;;  %v293_v55 = vxor.u32 2147483648, %v1316_v26  ;;  %v472_v59 = vsel %vm1237_vm6, 0, %v1236_v34  ;;  %v1039_v60 = vrot.slane %v1725_v46, 4 }
  0xe2   : > { %v1070_v44 = vsel %vm157_vm4, %v1069_v1, %v1048_v23  ;;  %v290_v53 = vxor.u32 2147483648, %v1318_v43  ;;  %v473_v18 = vsub.s32 32, %v472_v59  ;;  %v477_v7 = vsub.s32 4294967266, %v472_v59 }
  0xe3   : > { %1095 = vst [vmem:[%s1740_s5 + $0x18] sm:$0xff] %v1070_v44  ;;  %v294_v56 = vsel %vm292_vm5, %v293_v55, %v1318_v43  ;;  %v709_v15 = vsel %vm707_vm15, %v293_v55, %v1318_v43  ;;  %v551_v8 = vsel %vm539_vm12, %v1671_v62, %v550_v39  ;;  %v474_v12 = vshll.u32 %v1689_v49, %v472_v59 }
  0xe4   : > { %v291_v3 = vsel %vm289_vm7, %v1316_v26, %v290_v53  ;;  %v706_v4 = vsel %vm704_vm10, %v1316_v26, %v290_v53  ;;  %v475_v0 = vshrl.u32 %v457_v51, %v473_v18  ;;  %v552_v9 = vsel %vm538_vm13, %v549_v32, %v551_v8 }
  0xe5   : > { %v295_v47 = vsel %vm288_vm14, %v291_v3, %v294_v56  ;;  %v710_v2 = vsel %vm703_vm8, %v706_v4, %v709_v15  ;;  %v478_v36 = vadd.s32 127, %v477_v7  ;;  %v1042_v33 = vrot.slane %v1723_v41, 4 }
  0xe6   : > { %v296_v54 = vsel %vm285_vm11, nan, %v295_v47  ;;  %v711_v10 = vsel %vm285_vm11, nan, %v710_v2  ;;  %v476_v6 = vor.u32 %v475_v0, %v474_v12  ;;  %vm1866_vm5 = vcmask 1041408  }
  0xe7   : > { %v1022_v13 = vrot.slane %v296_v54, 5  ;;  %v1025_v62 = vrot.slane %v711_v10, 2  ;;  %v1027_v14 = vrot.slane %v296_v54, 2  ;;  %v1029_v16 = vrot.slane %v711_v10, 7 }
  0xe8   : > { %v1032_v17 = vrot.slane %v296_v54, 7  ;;  %v1038_v20 = vrot.slane %v711_v10, 4  ;;  %v479_v24 = vshll.u32 %v478_v36, 23  ;;  %v483_v11 = vcvt.s32.f32 %v476_v6 }
  0xe9   : > { %v1062_v25 = vsel %vm155_vm2, %v1419_v5, %v1022_v13  ;;  %v1064_v38 = vsel %vm159_vm0, %v1025_v62, %v1027_v14  ;;  %v1768_v22 = vmul.u32.u64.low %v1732_v57, %v552_v9  ;;  %v1769_v27 = vmul.u32.u64.high %v1732_v57, %v552_v9, %v1768_v22 }
  0xea   : > { %v1063_v49 = vsel %vm157_vm4, %v1062_v25, %v1025_v62  ;;  %v1065_v28 = vsel %vm161_vm1, %v1064_v38, %v1029_v16  ;;  %v480_v32 = vor.u32 4788187, %v479_v24  ;;  %v1034_v5 = vsel %vm159_vm0, %v1032_v17, %v1033_v45 }
  0xeb   : > { %v1066_v35 = vsel %vm163_vm3, %v1065_v28, %v1032_v17  ;;  %1092 = vst [vmem:[%s1740_s5] sm:$0xff] %v1063_v49  ;;  %v1040_v63 = vsel %vm161_vm1, %v1038_v20, %v1039_v60  ;;  %v1782_v50 = vmul.u32.u64.low %v1732_v57, %v1709_v31  ;;  %v1783_v61 = vmul.u32.u64.high %v1732_v57, %v1709_v31, %v1782_v50 }
  0xec   : > { %1093 = vst [vmem:[%s1740_s5 + $0x8] sm:$0xff] %v1066_v35  ;;  %v481_v37 = vand.u32 2147483647, %v480_v32  ;;  %v1067_v40 = vsel %vm1866_vm5, %v1034_v5, %v1040_v63  ;;  %vm1867_vm12 = vcmask 1044480   ;;  %v487_v34 = vsub.s32 4, %v1666_v58 }
  0xed   : > { %v1068_v21 = vsel %vm1867_vm12, %v1067_v40, %v1042_v33  ;;  %v1789_v26 = vadd.s32 %v1782_v50, %v1769_v27  ;;  %vm562_vm9 = vc.u32 %v1769_v27, %v1782_v50  ;;  %v563_v43 = vadd.s32 1, %v1783_v61 }
  0xee   : > { %v484_v29 = vmul.f32 %v483_v11, %v481_v37  ;;  %1094 = vst [vmem:[%s1740_s5 + $0x10] sm:$0xff] %v1068_v21  ;;  %vm403_vm13 = vcmp.lt.s32.totalorder %v1444_v30, 0  ;;  %v560_v31 = vmul.u32 %v1732_v57, %v1697_v19  ;;  %vm402_vm11 = vcmp.le.f32.partialorder %v401_v52, 0.7853982 }
  0xef   : > { %v488_v44 = vsel %vm403_vm13, %v487_v34, %v1666_v58  ;;  %v564_v51 = vsel %vm562_vm9, %v563_v43, %v1783_v61  ;;  %vm493_vm5 = vweird.f32 %v1444_v30  ;;  %v1051_v14 = vrot.slane %v1723_v41, 6 }
  0xf0   : > { %v485_v1 = vxor.u32 2147483648, %v484_v29  ;;  %v565_v53 = vadd.s32 %v564_v51, %v560_v31  ;;  %v490_v59 = vsel %vm402_vm11, 0, %v488_v44  ;;  %v1056_v17 = vrot.slane %v1725_v46, 3 }
  0xf1   : > { %v494_v56 = vadd.s32 3, %v490_v59  ;;  %v908_v57 = vand.u32 3, %v490_v59  ;;  %vm1868_vm9 = vcmask 1041408  }
  0xf2   : > { %v486_v55 = vsel %vm403_vm13, %v485_v1, %v484_v29  ;;  %v566_v39 = vadd.s32 536870912, %v565_v53  ;;  %vm1869_vm13 = vcmask 1044480  }
  0xf3   : > { %v489_v45 = vsel %vm402_vm11, %v1444_v30, %v486_v55  ;;  %v495_v19 = vand.u32 3, %v494_v56  ;;  %vm910_vm10 = vcmp.eq.s32.totalorder %v908_v57, 0  ;;  %vm913_vm14 = vcmp.eq.s32.totalorder %v908_v57, 2  ;;  %vm1870_vm11 = vmmov %vm1868_vm9 }
  0xf4   : > { %1319 = vcosq.f32 %v489_v45  ;;  %v567_v60 = vshrl.u32 %v566_v39, 30  ;;  %vm909_vm6 = vcmp.lt.s32.totalorder %v908_v57, 2 }
  0xf5   : > { %1321 = vsinq.f32 %v489_v45  ;;  %vm500_vm8 = vcmp.eq.s32.totalorder %v495_v19, 2  ;;  %vm497_vm15 = vcmp.eq.s32.totalorder %v495_v19, 0  ;;  %vm496_vm7 = vcmp.lt.s32.totalorder %v495_v19, 2 }
  0xf6   : > { %v568_v15 = vshll.u32 %v567_v60, 30  ;;  %v591_v50 = vsub.s32 4, %v567_v60 }
  0xf8   : > { %v569_v18 = vsub.s32 %v565_v53, %v568_v15 }
  0xfa   : > { %v571_v3 = vsub.s32 0, %v569_v18 }
  0xfc   : > { %v1239_v58 = vmin.u32 %v571_v3, %v569_v18 }
  0xfe   : > { %v1320_v52 = vpop.eup %1319  ;;  %v573_v0 = vclz %v1239_v58 }
  0xff   : > { %v1322_v4 = vpop.eup %1321  ;;  %v501_v7 = vxor.u32 2147483648, %v1320_v52 }
 0x100   : > { %v498_v8 = vxor.u32 2147483648, %v1322_v4  ;;  %v1240_v36 = vadd.s32 4294967294, %v573_v0  ;;  %v1154_v0 = vld [vmem:[%s1740_s5 + $0x10] sm:$0xff] (%p1398_p4) }
 0x101   : > { %v502_v47 = vsel %vm500_vm8, %v501_v7, %v1322_v4  ;;  %v915_v2 = vsel %vm913_vm14, %v501_v7, %v1322_v4  ;;  %vm1871_vm8 = vmmov %vm1869_vm13  ;;  %vm506_vm14 = vcmp.le.f32.partialorder %v505_v42, 0.7853982  ;;  %1155 = vst [vmem:[%s1108_s9 + $0x80] sm:$0xff] (%p1398_p4), %v1154_v0 }
 0x102   : > { %v499_v9 = vsel %vm497_vm15, %v1320_v52, %v498_v8  ;;  %v912_v54 = vsel %vm910_vm10, %v1320_v52, %v498_v8  ;;  %vm1241_vm12 = vcmp.lt.s32.totalorder %v1240_v36, 0  ;;  %vm507_vm10 = vcmp.lt.s32.totalorder %v1451_v48, 0 }
 0x103   : > { %v503_v10 = vsel %vm496_vm7, %v499_v9, %v502_v47  ;;  %v916_v12 = vsel %vm909_vm6, %v912_v54, %v915_v2  ;;  %v576_v38 = vsel %vm1241_vm12, 0, %v1240_v36  ;;  %v592_v29 = vsel %vm507_vm10, %v591_v50, %v567_v60  ;;  %v1152_v2 = vld [vmem:[%s1740_s5 + $0x8] sm:$0xff] (%p1398_p4)  ;;  %v1156_v9 = vld [vmem:[%s1740_s5 + $0x18] sm:$0xff] (%p1398_p4) }
 0x104   : > { %v504_v13 = vsel %vm493_vm5, nan, %v503_v10  ;;  %v1802_v62 = vsel %vm493_vm5, nan, %v916_v12  ;;  %v577_v27 = vsub.s32 32, %v576_v38  ;;  %v581_v28 = vsub.s32 4294967266, %v576_v38  ;;  %1153 = vst [vmem:[%s1108_s9 + $0x40] sm:$0xff] (%p1398_p4), %v1152_v2  ;;  %1157 = vst [vmem:[%s1108_s9 + $0xc0] sm:$0xff] (%p1398_p4), %v1156_v9 }
 0x105   : > { %v1052_v16 = vrot.slane %v504_v13, 6  ;;  %v1057_v20 = vrot.slane %v1802_v62, 3  ;;  %v1060_v6 = vrot.slane %v504_v13, 3  ;;  %v578_v33 = vshll.u32 %v569_v18, %v576_v38 }
 0x106   : > { %v579_v35 = vshrl.u32 %v1789_v26, %v577_v27  ;;  %v582_v11 = vadd.s32 127, %v581_v28  ;;  %v594_v26 = vsel %vm506_vm14, 0, %v592_v29  ;;  %v1076_v60 = vrot.slane %v1802_v62, 5 }
 0x107   : > { %v1053_v24 = vsel %vm1868_vm9, %v1051_v14, %v1052_v16  ;;  %v1058_v30 = vsel %vm1869_vm13, %v1056_v17, %v1057_v20  ;;  %v1074_v25 = vsel %vm1870_vm11, %v1060_v6, %v1802_v62  ;;  %v598_v1 = vadd.s32 3, %v594_v26 }
 0x108   : > { %v1071_v41 = vsel %vm159_vm0, %v1048_v23, %v1053_v24  ;;  %v1075_v22 = vsel %vm1871_vm8, %v1074_v25, %v504_v13  ;;  %v580_v5 = vor.u32 %v579_v35, %v578_v33  ;;  %v583_v63 = vshll.u32 %v582_v11, 23 }
 0x109   : > { %v1072_v49 = vsel %vm161_vm1, %v1071_v41, %v1058_v30  ;;  %1097 = vst [vmem:[%s1740_s5 + $0x28] sm:$0xff] %v1075_v22  ;;  %v599_v43 = vand.u32 3, %v598_v1  ;;  %v1011_v31 = vand.u32 3, %v594_v26  ;;  %vm597_vm9 = vweird.f32 %v1451_v48 }
 0x10a   : > { %v1073_v32 = vsel %vm163_vm3, %v1072_v49, %v1060_v6  ;;  %v584_v37 = vor.u32 4788187, %v583_v63  ;;  %v587_v40 = vcvt.s32.f32 %v580_v5 }
 0x10b   : > { %1096 = vst [vmem:[%s1740_s5 + $0x20] sm:$0xff] %v1073_v32  ;;  %vm604_vm3 = vcmp.eq.s32.totalorder %v599_v43, 2  ;;  %vm1016_vm15 = vcmp.eq.s32.totalorder %v1011_v31, 2  ;;  %vm601_vm7 = vcmp.eq.s32.totalorder %v599_v43, 0  ;;  %vm1013_vm6 = vcmp.eq.s32.totalorder %v1011_v31, 0 }
 0x10c   : > { %v585_v46 = vand.u32 2147483647, %v584_v37  ;;  %vm600_vm5 = vcmp.lt.s32.totalorder %v599_v43, 2  ;;  %vm1012_vm12 = vcmp.lt.s32.totalorder %v1011_v31, 2 }
 0x10e   : > { %v588_v23 = vmul.f32 %v587_v40, %v585_v46 }
 0x110   : > { %v589_v61 = vxor.u32 2147483648, %v588_v23  ;;  %v1160_v10 = vld [vmem:[%s1740_s5 + $0x28] sm:$0xff] (%p1398_p4) }
 0x111   : > { %1161 = vst [vmem:[%s1108_s9 + $0x140] sm:$0xff] (%p1398_p4), %v1160_v10 }
 0x112   : > { %v590_v21 = vsel %vm507_vm10, %v589_v61, %v588_v23  ;;  %v1158_v54 = vld [vmem:[%s1740_s5 + $0x20] sm:$0xff] (%p1398_p4) }
 0x113   : > { %v593_v34 = vsel %vm506_vm14, %v1451_v48, %v590_v21  ;;  %v1150_v48 = vld [vmem:[%s1740_s5] sm:$0xff] (%p1398_p4)  ;;  %1159 = vst [vmem:[%s1108_s9 + $0x100] sm:$0xff] (%p1398_p4), %v1158_v54 }
 0x114   : > { %1323 = vcosq.f32 %v593_v34  ;;  %1151 = vst [vmem:[%s1108_s9] sm:$0xff] (%p1398_p4), %v1150_v48 }
 0x115   : > { %1325 = vsinq.f32 %v593_v34 }
 0x11e   : > { %v1324_v55 = vpop.eup %1323 }
 0x11f   : > { %v1326_v44 = vpop.eup %1325  ;;  %v605_v51 = vxor.u32 2147483648, %v1324_v55 }
 0x120   : > { %v602_v45 = vxor.u32 2147483648, %v1326_v44 }
 0x121   : > { %v606_v53 = vsel %vm604_vm3, %v605_v51, %v1326_v44  ;;  %v1018_v42 = vsel %vm1016_vm15, %v605_v51, %v1326_v44 }
 0x122   : > { %v603_v59 = vsel %vm601_vm7, %v1324_v55, %v602_v45  ;;  %v1015_v39 = vsel %vm1013_vm6, %v1324_v55, %v602_v45 }
 0x123   : > { %v607_v56 = vsel %vm600_vm5, %v603_v59, %v606_v53  ;;  %v1019_v15 = vsel %vm1012_vm12, %v1015_v39, %v1018_v42  ;;  %1106 = sbr.rel (!%p1398_p4) target bundleno = 306 (0x132), region = 32 }
 0x124   : > { %v608_v18 = vsel %vm597_vm9, nan, %v607_v56  ;;  %v1020_v19 = vsel %vm597_vm9, nan, %v1019_v15 }
 0x125   : > { %v1079_v57 = vrot.slane %v608_v18, 5  ;;  %v1082_v3 = vrot.slane %v1020_v19, 2  ;;  %v1084_v52 = vrot.slane %v608_v18, 2  ;;  %v1086_v4 = vrot.slane %v1020_v19, 7 }
 0x127   : > { %v1088_v7 = vsel %vm155_vm2, %v1076_v60, %v1079_v57  ;;  %v1090_v58 = vsel %vm159_vm0, %v1082_v3, %v1084_v52 }
 0x128   : > { %v1089_v8 = vsel %vm157_vm4, %v1088_v7, %v1082_v3  ;;  %v1091_v47 = vsel %vm161_vm1, %v1090_v58, %v1086_v4 }
 0x129   : > { %1098 = vst [vmem:[%s1740_s5 + $0x30] sm:$0xff] %v1089_v8  ;;  %1099 = vst [vmem:[%s1740_s5 + $0x38] sm:$0x7f] %v1091_v47 }
 0x130   : > { %v1162_v12 = vld [vmem:[%s1740_s5 + $0x30] sm:$0xff]  ;;  %v1164_v36 = vld [vmem:[%s1740_s5 + $0x38] sm:$0xff] }
 0x131   : > { %1163 = vst [vmem:[%s1108_s9 + $0x180] sm:$0xff] %v1162_v12  ;;  %1165 = vst [vmem:[%s1108_s9 + $0x1c0] sm:$0xff] %v1164_v36 }
 0x132 PF: > { %p9_p8 = scmp.ge.s32.totalorder %s1388_s13, 10   ;;  %s1872_s9 = smov %s1345_s10 }
 0x133   : > { %s1873_s10 = smov %s1396_s16  ;;  %s1874_s11 = smov %s1388_s13 }
 0x134   :  { %11 = sbr.rel (!%p9_p8) target bundleno = 2 (0x2), region = 96 }

</bundles_post_ra>
